<compile_context>
chip_gen: v7x
topology: tpu7x:2x2x1
jax: 0.10.0
libtpu: 0.0.40
codegen_flags: <defaults>
</compile_context>

<pallas_src>
import functools
from math import sqrt

import jax
import jax.numpy as jnp
from jax.experimental import pallas as pl
from jax.experimental.pallas import tpu as pltpu


def _residual_block_kernel(x_ref, cond_ref, dproj_ref, halo_ref,
                           w_ref, wo_ref, b_ref, bo_ref,
                           res_ref, skip_ref,
                           *, dilation, kernel_size, tl, seq_len, needs_mask):
    x = x_ref[0]                                   # (C, TL) f32, lane-dense on L
    C = x.shape[0]
    cdt = w_ref.dtype                              # matmul operand dtype (bf16 or f32)

    # y = x + diffusion projection (projection hoisted to the wrapper; broadcast over L).
    y = x + dproj_ref[0]                           # (C, TL) f32
    if needs_mask:
        # Zero the padded tail so the dilated conv's implicit zero padding stays exact.
        # Interior tiles have rem >= TL so the select is a no-op there; a branch-free
        # compare-with-scalar is cheaper than a value-producing cond in this HBM-bound kernel.
        lane = jax.lax.broadcasted_iota(jnp.int32, (C, tl), 1)
        rem = seq_len - pl.program_id(1) * tl
        y = jnp.where(lane < rem, y, 0.0)
    y_c = y.astype(cdt)

    # Cross-tile halo columns of y (precomputed in the wrapper; zero outside [0, L),
    # matching the conv's zero padding).  Layout: [left halo | right halo].
    halos = halo_ref[0, 0]                         # (C, 2*halo) cdt
    halo = halos.shape[1] // 2
    half = (kernel_size - 1) // 2

    # Shifted conv taps.  A static-shift jnp.roll lowers to the same slice+concat,
    # so the explicit form is kept; these copies are tiny vs. the tile's HBM traffic.
    taps = []
    for k in range(kernel_size):
        off = (k - half) * dilation                # this tap reads y[:, l + off]
        if off == 0:
            taps.append(y_c)
        elif off < 0:
            taps.append(jnp.concatenate(
                [halos[:, halo + off:halo], y_c[:, :tl + off]], axis=1))
        else:
            taps.append(jnp.concatenate(
                [y_c[:, off:], halos[:, halo:halo + off]], axis=1))
    # Fold the conditioner into the same contraction: one matmul for the whole pre-activation.
    taps.append(cond_ref[0])                       # (n_bin, TL) cdt
    y_stack = jnp.concatenate(taps, axis=0)        # (K*C + n_bin, TL)

    # z = [Wdil | Wcond] @ [taps ; cond] + (dil_b + cond_b); gate rows [0:C], filter [C:2C].
    z = jnp.dot(w_ref[...], y_stack, preferred_element_type=jnp.float32) + b_ref[...]
    h = (jax.nn.sigmoid(z[:C]) * jnp.tanh(z[C:])).astype(cdt)        # (C, TL), f32 math

    # Fused output projection; residual rows [0:C], skip rows [C:2C] (sublane-aligned split).
    out = jnp.dot(wo_ref[...], h, preferred_element_type=jnp.float32) + bo_ref[...]
    res_ref[0] = ((x + out[:C]) * (1.0 / sqrt(2.0))).astype(res_ref.dtype)
    skip_ref[0] = out[C:].astype(skip_ref.dtype)


def residual_block_pallas(x, diffusion_step, conditioner, params, *,
                          dilation, kernel_size=3, tl=1024,
                          compute_dtype=jnp.bfloat16,
                          vmem_limit_bytes=32 * 1024 * 1024):
    """x: (B, C, L); diffusion_step: (B, 1, FC); conditioner: (B, L, n_bin).

    Returns ((x + residual)/sqrt(2), skip), both (B, C, L) float32.

    tl: sequence-tile (lane) width, multiple of 128 (auto-clamped to cover L).  The
        streamed working set per step is roughly
          2*TL*(4B*C + itemsize*n_bin + 4B*2C)            (double-buffered x / cond / outputs)
        + TL*(4B*C + 2*itemsize*(K*C+n_bin) + 16B*C + itemsize*C)   (in-kernel temporaries)
        and is checked against vmem_limit_bytes.  v7x has 64 MiB physical VMEM per
        TensorCore (half of v5e/v6e): keep the limit <= ~48 MiB there; 32 MiB works
        everywhere and still allows TL of a few thousand at C=16.
    compute_dtype: dtype of the matmul operands (weights / conv taps / conditioner).
        bf16 (default) halves their HBM+VMEM traffic and doubles MXU rate on v6e/v7x;
        accumulation is f32 (preferred_element_type) and all elementwise math (sigmoid,
        tanh, residual, masking) stays f32 (v5e VPU/EUP have no bf16).
    Grid is (B, nt), both axes "parallel" -> megacore sharding on v7x (keep B*nt >= 2,
    ideally even); measured near-zero impact on v5e/v6e.
    """
    B, C, L = x.shape
    n_bin = conditioner.shape[-1]
    assert kernel_size % 2 == 1, "only 'same'-padded odd kernel sizes are supported"
    half = (kernel_size - 1) // 2

    tl = min(tl, -(-L // 128) * 128)               # never tile wider than padded L
    assert tl % 128 == 0, "tl must be a multiple of 128 (lane width)"
    assert half * dilation <= tl, "conv halo must fit inside one neighbouring tile"
    halo = max(half * dilation, 1)

    nt = -(-L // tl)
    Lp = nt * tl
    pad = Lp - L

    f32 = jnp.float32
    cd = jnp.dtype(compute_dtype)
    isz = cd.itemsize

    stream = 2 * tl * (C * 4 + n_bin * isz + 2 * C * 4)
    temps = tl * (C * 4 + 2 * (kernel_size * C + n_bin) * isz + 4 * C * 4 + C * isz)
    if stream + temps > vmem_limit_bytes:
        raise ValueError(
            f"tl={tl} needs ~{(stream + temps) >> 20} MiB scoped VMEM; "
            f"lower tl or raise vmem_limit_bytes")

    xp = x.astype(f32)
    condp = jnp.transpose(conditioner, (0, 2, 1)).astype(cd)   # (B, n_bin, L), lane-dense
    if pad:
        xp = jnp.pad(xp, ((0, 0), (0, 0), (0, pad)))
        condp = jnp.pad(condp, ((0, 0), (0, 0), (0, pad)))

    # Hoisted diffusion projection: Linear(FC -> C), one (C,) vector per batch element.
    dproj = (jnp.einsum("bif,cf->bic", diffusion_step.astype(f32), params["diff_w"])
             + params["diff_b"])                        # (B, 1, C)
    dproj = jnp.transpose(dproj, (0, 2, 1))             # (B, C, 1)

    # Cross-tile halo strips of y = x + dproj (zero outside [0, L) == conv zero pad),
    # merged into a single (B, nt, C, 2*halo) array: one small DMA per grid step.
    x_t = xp.reshape(B, C, nt, tl)
    if pad:
        valid = (jnp.arange(Lp) < L).astype(f32).reshape(nt, tl)
        m_l = valid[None, None, :, tl - halo:]
        m_r = valid[None, None, :, :halo]
    else:
        m_l = m_r = 1.0
    left_y = x_t[:, :, :, tl - halo:] + dproj[:, :, None, :] * m_l    # (B, C, nt, halo)
    right_y = x_t[:, :, :, :halo] + dproj[:, :, None, :] * m_r
    zpad = jnp.zeros((B, C, 1, halo), f32)
    lhalo = jnp.concatenate([zpad, left_y[:, :, :-1]], axis=2)        # tile i <- tile i-1
    rhalo = jnp.concatenate([right_y[:, :, 1:], zpad], axis=2)        # tile i <- tile i+1
    halos = jnp.concatenate([lhalo, rhalo], axis=3)                   # (B, C, nt, 2*halo)
    halos = jnp.transpose(halos, (0, 2, 1, 3)).astype(cd)             # (B, nt, C, 2*halo)

    # Fused weights: the K conv taps and the 1x1 conditioner projection share one
    # (2C, K*C + n_bin) matrix (gate rows [0:C], filter [C:2C]); biases are summed.
    # Output projection stays one (2C, C) matrix (residual rows [0:C], skip [C:2C]).
    w_taps = [params["dil_w"][:, :, k] for k in range(kernel_size)]
    w_fused = jnp.concatenate(w_taps + [params["cond_w"][:, :, 0]], axis=1).astype(cd)
    b_fused = (params["dil_b"] + params["cond_b"]).reshape(2 * C, 1).astype(f32)
    w_out = params["out_w"][:, :, 0].astype(cd)                       # (2C, C)
    b_out = params["out_b"].reshape(2 * C, 1).astype(f32)

    def _full(shape):
        n = len(shape)
        return pl.BlockSpec(shape, lambda b, i, _n=n: (0,) * _n)

    kernel = functools.partial(_residual_block_kernel,
                               dilation=dilation, kernel_size=kernel_size,
                               tl=tl, seq_len=L, needs_mask=(pad > 0))

    res, skip = pl.pallas_call(
        kernel,
        out_shape=(jax.ShapeDtypeStruct((B, C, Lp), f32),
                   jax.ShapeDtypeStruct((B, C, Lp), f32)),
        grid_spec=pltpu.PrefetchScalarGridSpec(
            num_scalar_prefetch=0,
            grid=(B, nt),
            in_specs=[
                pl.BlockSpec((1, C, tl), lambda b, i: (b, 0, i)),             # x tile
                pl.BlockSpec((1, n_bin, tl), lambda b, i: (b, 0, i)),         # conditioner tile
                pl.BlockSpec((1, C, 1), lambda b, i: (b, 0, 0)),              # diffusion proj
                pl.BlockSpec((1, 1, C, 2 * halo), lambda b, i: (b, i, 0, 0)),  # merged halos
                _full((2 * C, kernel_size * C + n_bin)),                      # fused conv+cond W
                _full((2 * C, C)),                                            # fused output W
                _full((2 * C, 1)), _full((2 * C, 1)),                         # biases
            ],
            out_specs=[
                pl.BlockSpec((1, C, tl), lambda b, i: (b, 0, i)),
                pl.BlockSpec((1, C, tl), lambda b, i: (b, 0, i)),
            ],
        ),
        compiler_params=pltpu.CompilerParams(
            # Both axes are independent -> megacore sharding on v7x; harmless on v5e/v6e.
            dimension_semantics=("parallel", "parallel"),
            vmem_limit_bytes=vmem_limit_bytes),
    )(xp, condp, dproj, halos, w_fused, w_out, b_fused, b_out)

    if pad:
        res, skip = res[:, :, :L], skip[:, :, :L]
    return res, skip


def residual_block_ref(x, diffusion_step, conditioner, params,
                       *, dilation, kernel_size=3):
    """Pure-JAX reference (matches the PyTorch forward)."""
    B, C, L = x.shape
    d = jnp.einsum("bif,cf->bic", diffusion_step, params["diff_w"]) + params["diff_b"]
    y = x + jnp.transpose(d, (0, 2, 1))                              # (B, C, L)
    cond = jnp.transpose(conditioner, (0, 2, 1))                     # (B, n_bin, L)
    cond = jax.lax.conv_general_dilated(
        cond, params["cond_w"], window_strides=(1,), padding=[(0, 0)],
        dimension_numbers=("NCH", "OIH", "NCH")) + params["cond_b"][None, :, None]
    pad = dilation * (kernel_size - 1) // 2
    z = jax.lax.conv_general_dilated(
        y, params["dil_w"], window_strides=(1,), padding=[(pad, pad)],
        rhs_dilation=(dilation,),
        dimension_numbers=("NCH", "OIH", "NCH")) + params["dil_b"][None, :, None]
    z = z + cond
    gate, filt = z[:, :C], z[:, C:]
    h = jax.nn.sigmoid(gate) * jnp.tanh(filt)
    out = jax.lax.conv_general_dilated(
        h, params["out_w"], window_strides=(1,), padding=[(0, 0)],
        dimension_numbers=("NCH", "OIH", "NCH")) + params["out_b"][None, :, None]
    residual, skip = out[:, :C], out[:, C:]
    return (x + residual) / sqrt(2.0), skip


def init_params(key, conditioner_size, diffusion_FC_size, residual_channels,
                kernel_size=3):
    C = residual_channels
    ks = jax.random.split(key, 8)

    def kaiming(k, shape, fan_in):
        return jax.random.normal(k, shape, jnp.float32) * jnp.sqrt(2.0 / fan_in)

    return {
        # dilated_conv: Conv1d(C -> 2C, k) weight (2C, C, k), bias (2C,)
        "dil_w": kaiming(ks[0], (2 * C, C, kernel_size), C * kernel_size),
        "dil_b": 0.01 * jax.random.normal(ks[1], (2 * C,), jnp.float32),
        # diffusion_projection: Linear(FC -> C) weight (C, FC), bias (C,)
        "diff_w": jax.random.normal(ks[2], (C, diffusion_FC_size), jnp.float32)
                  / jnp.sqrt(float(diffusion_FC_size)),
        "diff_b": 0.01 * jax.random.normal(ks[3], (C,), jnp.float32),
        # conditioner_projection: Conv1d(n_bin -> 2C, 1)
        "cond_w": kaiming(ks[4], (2 * C, conditioner_size, 1), conditioner_size),
        "cond_b": 0.01 * jax.random.normal(ks[5], (2 * C,), jnp.float32),
        # output_projection: Conv1d(C -> 2C, 1)
        "out_w": kaiming(ks[6], (2 * C, C, 1), C),
        "out_b": 0.01 * jax.random.normal(ks[7], (2 * C,), jnp.float32),
    }


if __name__ == "__main__":
    B, C, L = 2, 16, 2048                  # batch, residual_channels, seq length
    conditioner_size, FC = 32, 64          # n_bin, diffusion_FC_size
    dilation, kernel_size = 4, 3

    key = jax.random.PRNGKey(0)
    k_x, k_t, k_c, k_p = jax.random.split(key, 4)
    x = jax.random.normal(k_x, (B, C, L), jnp.float32)
    diffusion_step = jax.random.normal(k_t, (B, 1, FC), jnp.float32)
    conditioner = jax.random.normal(k_c, (B, L, conditioner_size), jnp.float32)
    params = init_params(k_p, conditioner_size, FC, C, kernel_size)

    res_ref_, skip_ref_ = residual_block_ref(x, diffusion_step, conditioner, params,
                                             dilation=dilation, kernel_size=kernel_size)

    # 1) f32 matmul operands, default tl=1024 -> grid (2, 2); tight tolerance
    res, skip = residual_block_pallas(x, diffusion_step, conditioner, params,
                                      dilation=dilation, kernel_size=kernel_size,
                                      compute_dtype=jnp.float32)
    jax.block_until_ready((res, skip))
    assert res.shape == (B, C, L) and skip.shape == (B, C, L)
    assert jnp.allclose(res, res_ref_, atol=1e-4, rtol=1e-4)
    assert jnp.allclose(skip, skip_ref_, atol=1e-4, rtol=1e-4)

    # 2) default bf16 matmul operands (f32 accumulate / elementwise path)
    res_b, skip_b = residual_block_pallas(x, diffusion_step, conditioner, params,
                                          dilation=dilation, kernel_size=kernel_size)
    jax.block_until_ready((res_b, skip_b))
    assert jnp.allclose(res_b, res_ref_, atol=2e-1, rtol=1e-1)
    assert jnp.allclose(skip_b, skip_ref_, atol=2e-1, rtol=1e-1)

    # 3) ragged-L tail (L not a multiple of the tile): exercises the padded-tail mask
    L2 = 1200
    x2 = jax.random.normal(k_x, (B, C, L2), jnp.float32)
    cond2 = jax.random.normal(k_c, (B, L2, conditioner_size), jnp.float32)
    res2, skip2 = residual_block_pallas(x2, diffusion_step, cond2, params,
                                        dilation=dilation, kernel_size=kernel_size,
                                        compute_dtype=jnp.float32)
    res2_r, skip2_r = residual_block_ref(x2, diffusion_step, cond2, params,
                                         dilation=dilation, kernel_size=kernel_size)
    jax.block_until_ready((res2, skip2))
    assert jnp.allclose(res2, res2_r, atol=1e-4, rtol=1e-4)
    assert jnp.allclose(skip2, skip2_r, atol=1e-4, rtol=1e-4)

    print("KERNEL_OK")
</pallas_src>

<mosaic_0001>
module attributes {stable_mosaic.version = 11 : i64} {
  func.func @_residual_block_kernel(%arg0: i32, %arg1: i32, %arg2: memref<1x16x1024xf32, #tpu.memory_space<vmem>>, %arg3: memref<1x32x1024xf32, #tpu.memory_space<vmem>>, %arg4: memref<1x16x1xf32, #tpu.memory_space<vmem>>, %arg5: memref<1x1x16x8xf32, #tpu.memory_space<vmem>>, %arg6: memref<32x80xf32, #tpu.memory_space<vmem>>, %arg7: memref<32x16xf32, #tpu.memory_space<vmem>>, %arg8: memref<32x1xf32, #tpu.memory_space<vmem>>, %arg9: memref<32x1xf32, #tpu.memory_space<vmem>>, %arg10: memref<1x16x1024xf32, #tpu.memory_space<vmem>>, %arg11: memref<1x16x1024xf32, #tpu.memory_space<vmem>>) attributes {dimension_semantics = [#tpu.dimension_semantics<parallel>, #tpu.dimension_semantics<parallel>], iteration_bounds = array<i64: 2, 2>, scalar_prefetch = 0 : i64, scratch_operands = 0 : i64, tpu.core_type = #tpu.core_type<tc>, window_params = [{transform_indices = @transform_0, window_bounds = array<i64: 1, 16, 1024>}, {transform_indices = @transform_1, window_bounds = array<i64: 1, 32, 1024>}, {transform_indices = @transform_2, window_bounds = array<i64: 1, 16, 1>}, {transform_indices = @transform_3, window_bounds = array<i64: 1, 1, 16, 8>}, {pipeline_mode = #tpu.pipeline_mode<synchronous>, transform_indices = @transform_4, window_bounds = array<i64: 32, 80>}, {pipeline_mode = #tpu.pipeline_mode<synchronous>, transform_indices = @transform_5, window_bounds = array<i64: 32, 16>}, {pipeline_mode = #tpu.pipeline_mode<synchronous>, transform_indices = @transform_6, window_bounds = array<i64: 32, 1>}, {pipeline_mode = #tpu.pipeline_mode<synchronous>, transform_indices = @transform_7, window_bounds = array<i64: 32, 1>}, {transform_indices = @transform_8, window_bounds = array<i64: 1, 16, 1024>}, {transform_indices = @transform_9, window_bounds = array<i64: 1, 16, 1024>}]} {
    %c0 = arith.constant 0 : index
    %c0_0 = arith.constant 0 : index
    %c0_1 = arith.constant 0 : index
    %0 = vector.load %arg2[%c0, %c0_0, %c0_1] : memref<1x16x1024xf32, #tpu.memory_space<vmem>>, vector<1x16x1024xf32>
    %1 = vector.shape_cast %0 : vector<1x16x1024xf32> to vector<16x1024xf32>
    %c0_2 = arith.constant 0 : index
    %c0_3 = arith.constant 0 : index
    %c0_4 = arith.constant 0 : index
    %2 = vector.load %arg4[%c0_2, %c0_3, %c0_4] : memref<1x16x1xf32, #tpu.memory_space<vmem>>, vector<1x16x1xf32>
    %3 = vector.shape_cast %2 : vector<1x16x1xf32> to vector<16x1xf32>
    %4 = vector.broadcast %3 : vector<16x1xf32> to vector<16x1024xf32>
    %5 = arith.addf %1, %4 : vector<16x1024xf32>
    %c0_5 = arith.constant 0 : index
    %c0_6 = arith.constant 0 : index
    %c0_7 = arith.constant 0 : index
    %c0_8 = arith.constant 0 : index
    %6 = vector.load %arg5[%c0_5, %c0_6, %c0_7, %c0_8] : memref<1x1x16x8xf32, #tpu.memory_space<vmem>>, vector<1x1x16x8xf32>
    %7 = vector.shape_cast %6 : vector<1x1x16x8xf32> to vector<16x8xf32>
    %8 = vector.extract_strided_slice %7 {offsets = [0, 0], sizes = [16, 4], strides = [1, 1]} : vector<16x8xf32> to vector<16x4xf32>
    %9 = vector.extract_strided_slice %5 {offsets = [0, 0], sizes = [16, 1020], strides = [1, 1]} : vector<16x1024xf32> to vector<16x1020xf32>
    %10 = tpu.concatenate %8, %9 in 1 : vector<16x4xf32>, vector<16x1020xf32> -> vector<16x1024xf32>
    %11 = vector.extract_strided_slice %5 {offsets = [0, 4], sizes = [16, 1020], strides = [1, 1]} : vector<16x1024xf32> to vector<16x1020xf32>
    %12 = vector.extract_strided_slice %7 {offsets = [0, 4], sizes = [16, 4], strides = [1, 1]} : vector<16x8xf32> to vector<16x4xf32>
    %13 = tpu.concatenate %11, %12 in 1 : vector<16x1020xf32>, vector<16x4xf32> -> vector<16x1024xf32>
    %c0_9 = arith.constant 0 : index
    %c0_10 = arith.constant 0 : index
    %c0_11 = arith.constant 0 : index
    %14 = vector.load %arg3[%c0_9, %c0_10, %c0_11] : memref<1x32x1024xf32, #tpu.memory_space<vmem>>, vector<1x32x1024xf32>
    %15 = vector.shape_cast %14 : vector<1x32x1024xf32> to vector<32x1024xf32>
    %16 = tpu.concatenate %10, %5, %13, %15 in 0 : vector<16x1024xf32>, vector<16x1024xf32>, vector<16x1024xf32>, vector<32x1024xf32> -> vector<80x1024xf32>
    %c0_12 = arith.constant 0 : index
    %c0_13 = arith.constant 0 : index
    %17 = vector.load %arg6[%c0_12, %c0_13] : memref<32x80xf32, #tpu.memory_space<vmem>>, vector<32x80xf32>
    %cst = arith.constant dense<0.000000e+00> : vector<32x1024xf32>
    %18 = tpu.matmul %17, %16, %cst {dimension_numbers = #tpu.dot_dimension_numbers<[1], [0], [0], [1], [0, 0, 1, 1], [], []>} : vector<32x80xf32>, vector<80x1024xf32>, vector<32x1024xf32> -> vector<32x1024xf32>
    %c0_14 = arith.constant 0 : index
    %c0_15 = arith.constant 0 : index
    %19 = vector.load %arg8[%c0_14, %c0_15] : memref<32x1xf32, #tpu.memory_space<vmem>>, vector<32x1xf32>
    %20 = vector.broadcast %19 : vector<32x1xf32> to vector<32x1024xf32>
    %21 = arith.addf %18, %20 : vector<32x1024xf32>
    %22 = vector.extract_strided_slice %21 {offsets = [0, 0], sizes = [16, 1024], strides = [1, 1]} : vector<32x1024xf32> to vector<16x1024xf32>
    %23 = arith.negf %22 : vector<16x1024xf32>
    %24 = math.exp %23 : vector<16x1024xf32>
    %cst_16 = arith.constant 1.000000e+00 : f32
    %25 = vector.broadcast %cst_16 : f32 to vector<16x1024xf32>
    %26 = arith.addf %25, %24 : vector<16x1024xf32>
    %27 = arith.divf %25, %26 : vector<16x1024xf32>
    %28 = vector.extract_strided_slice %21 {offsets = [16, 0], sizes = [16, 1024], strides = [1, 1]} : vector<32x1024xf32> to vector<16x1024xf32>
    %29 = math.tanh %28 : vector<16x1024xf32>
    %30 = arith.mulf %27, %29 : vector<16x1024xf32>
    %c0_17 = arith.constant 0 : index
    %c0_18 = arith.constant 0 : index
    %31 = vector.load %arg7[%c0_17, %c0_18] : memref<32x16xf32, #tpu.memory_space<vmem>>, vector<32x16xf32>
    %cst_19 = arith.constant dense<0.000000e+00> : vector<32x1024xf32>
    %32 = tpu.matmul %31, %30, %cst_19 {dimension_numbers = #tpu.dot_dimension_numbers<[1], [0], [0], [1], [0, 0, 1, 1], [], []>} : vector<32x16xf32>, vector<16x1024xf32>, vector<32x1024xf32> -> vector<32x1024xf32>
    %c0_20 = arith.constant 0 : index
    %c0_21 = arith.constant 0 : index
    %33 = vector.load %arg9[%c0_20, %c0_21] : memref<32x1xf32, #tpu.memory_space<vmem>>, vector<32x1xf32>
    %34 = vector.broadcast %33 : vector<32x1xf32> to vector<32x1024xf32>
    %35 = arith.addf %32, %34 : vector<32x1024xf32>
    %36 = vector.extract_strided_slice %35 {offsets = [0, 0], sizes = [16, 1024], strides = [1, 1]} : vector<32x1024xf32> to vector<16x1024xf32>
    %37 = arith.addf %1, %36 : vector<16x1024xf32>
    %cst_22 = arith.constant 0.707106769 : f32
    %38 = vector.broadcast %cst_22 : f32 to vector<16x1024xf32>
    %39 = arith.mulf %37, %38 : vector<16x1024xf32>
    %c0_23 = arith.constant 0 : index
    %c0_24 = arith.constant 0 : index
    %c0_25 = arith.constant 0 : index
    %40 = vector.load %arg10[%c0_23, %c0_24, %c0_25] : memref<1x16x1024xf32, #tpu.memory_space<vmem>>, vector<1x16x1024xf32>
    %41 = vector.shape_cast %40 : vector<1x16x1024xf32> to vector<16x1024xf32>
    %42 = vector.shape_cast %39 : vector<16x1024xf32> to vector<1x16x1024xf32>
    tpu.vector_store %arg10[%c0_23, %c0_24, %c0_25], %42 {strides = array<i32>} : memref<1x16x1024xf32, #tpu.memory_space<vmem>>, vector<1x16x1024xf32>,
    %43 = vector.extract_strided_slice %35 {offsets = [16, 0], sizes = [16, 1024], strides = [1, 1]} : vector<32x1024xf32> to vector<16x1024xf32>
    %c0_26 = arith.constant 0 : index
    %c0_27 = arith.constant 0 : index
    %c0_28 = arith.constant 0 : index
    %44 = vector.load %arg11[%c0_26, %c0_27, %c0_28] : memref<1x16x1024xf32, #tpu.memory_space<vmem>>, vector<1x16x1024xf32>
    %45 = vector.shape_cast %44 : vector<1x16x1024xf32> to vector<16x1024xf32>
    %46 = vector.shape_cast %43 : vector<16x1024xf32> to vector<1x16x1024xf32>
    tpu.vector_store %arg11[%c0_26, %c0_27, %c0_28], %46 {strides = array<i32>} : memref<1x16x1024xf32, #tpu.memory_space<vmem>>, vector<1x16x1024xf32>,
    return
  }
  func.func @transform_0(%arg0: i32, %arg1: i32) -> (i32, i32, i32) {
    %c0_i32 = arith.constant 0 : i32
    %c0_i32_0 = arith.constant 0 : i32
    return %arg0, %c0_i32, %arg1 : i32, i32, i32
  }
  func.func @transform_1(%arg0: i32, %arg1: i32) -> (i32, i32, i32) {
    %c0_i32 = arith.constant 0 : i32
    %c0_i32_0 = arith.constant 0 : i32
    return %arg0, %c0_i32, %arg1 : i32, i32, i32
  }
  func.func @transform_2(%arg0: i32, %arg1: i32) -> (i32, i32, i32) {
    %c0_i32 = arith.constant 0 : i32
    %c0_i32_0 = arith.constant 0 : i32
    %c0_i32_1 = arith.constant 0 : i32
    return %arg0, %c0_i32, %c0_i32_0 : i32, i32, i32
  }
  func.func @transform_3(%arg0: i32, %arg1: i32) -> (i32, i32, i32, i32) {
    %c0_i32 = arith.constant 0 : i32
    %c0_i32_0 = arith.constant 0 : i32
    %c0_i32_1 = arith.constant 0 : i32
    return %arg0, %arg1, %c0_i32, %c0_i32_0 : i32, i32, i32, i32
  }
  func.func @transform_4(%arg0: i32, %arg1: i32) -> (i32, i32) {
    %c0_i32 = arith.constant 0 : i32
    %c0_i32_0 = arith.constant 0 : i32
    %c0_i32_1 = arith.constant 0 : i32
    return %c0_i32, %c0_i32_0 : i32, i32
  }
  func.func @transform_5(%arg0: i32, %arg1: i32) -> (i32, i32) {
    %c0_i32 = arith.constant 0 : i32
    %c0_i32_0 = arith.constant 0 : i32
    %c0_i32_1 = arith.constant 0 : i32
    return %c0_i32, %c0_i32_0 : i32, i32
  }
  func.func @transform_6(%arg0: i32, %arg1: i32) -> (i32, i32) {
    %c0_i32 = arith.constant 0 : i32
    %c0_i32_0 = arith.constant 0 : i32
    %c0_i32_1 = arith.constant 0 : i32
    return %c0_i32, %c0_i32_0 : i32, i32
  }
  func.func @transform_7(%arg0: i32, %arg1: i32) -> (i32, i32) {
    %c0_i32 = arith.constant 0 : i32
    %c0_i32_0 = arith.constant 0 : i32
    %c0_i32_1 = arith.constant 0 : i32
    return %c0_i32, %c0_i32_0 : i32, i32
  }
  func.func @transform_8(%arg0: i32, %arg1: i32) -> (i32, i32, i32) {
    %c0_i32 = arith.constant 0 : i32
    %c0_i32_0 = arith.constant 0 : i32
    return %arg0, %c0_i32, %arg1 : i32, i32, i32
  }
  func.func @transform_9(%arg0: i32, %arg1: i32) -> (i32, i32, i32) {
    %c0_i32 = arith.constant 0 : i32
    %c0_i32_0 = arith.constant 0 : i32
    return %arg0, %c0_i32, %arg1 : i32, i32, i32
  }
}

</mosaic_0001>

<bundles_post_ra>
// kernel: tpu_custom_call.1
= control target key start
LH: loop header
LB: loop body
LE: loop exit
PB: predicated region body
PF: predicated region fallthrough
CT: control target
= control target key end

     0   :  { %s3487_s0 = inlined_call_operand.hbm [shape: f32[2,16,2048], index: 0, kind: input, shape index: {}]   ;;  %s3488_s1 = inlined_call_operand.hbm [shape: f32[2,32,2048], index: 1, kind: input, shape index: {}]   ;;  %s3489_s2 = inlined_call_operand.vmem [shape: f32[2,16,1], index: 2, kind: input, shape index: {}]   ;;  %s3490_s3 = inlined_call_operand.vmem [shape: f32[2,2,16,8], index: 3, kind: input, shape index: {}]   ;;  %s3491_s4 = inlined_call_operand.vmem [shape: f32[32,80], index: 4, kind: input, shape index: {}]   ;;  %s3492_s5 = inlined_call_operand.vmem [shape: f32[32,16], index: 5, kind: input, shape index: {}]   ;;  %s3493_s6 = inlined_call_operand.vmem [shape: f32[32,1], index: 6, kind: input, shape index: {}]   ;;  %s3494_s7 = inlined_call_operand.vmem [shape: f32[32,1], index: 7, kind: input, shape index: {}]   ;;  %s3495_s8 = inlined_call_operand.hbm [shape: f32[2,16,2048], index: 8, kind: output, shape index: {0}]   ;;  %s3496_s9 = inlined_call_operand.hbm [shape: f32[2,16,2048], index: 9, kind: output, shape index: {1}]  }
   0x1   :  { %3510 = sst [smem:[#allocation21_spill]] %s3487_s0 }
   0x2   :  { %3511 = sst [smem:[#allocation22_spill]] %s3491_s4 }
   0x3   :  { %3512 = sst [smem:[#allocation23_spill]] %s3492_s5 }
   0x4   :  { %3513 = sst [smem:[#allocation24_spill]] %s3495_s8 }
   0x5   :  { %3514 = sst [smem:[#allocation25_spill]] %s3496_s9 }
   0x6   :  { %15 = vsyncpa [#allocation3], 0 }
   0x7   :  { %17 = vsyncpa [#allocation3 + $0x1], 0 }
   0x8   :  { %18 = vsyncpa [#allocation6], 0 }
   0x9   :  { %20 = vsyncpa [#allocation6 + $0x1], 0 }
   0xa   :  { %21 = vsyncpa [#allocation4], 0 }
   0xb   :  { %23 = vsyncpa [#allocation4 + $0x1], 0 }
   0xc   :  { %24 = vsyncpa [#allocation9], 0 }
   0xd   :  { %26 = vsyncpa [#allocation9 + $0x1], 0  ;;  %s2661_s30 = smov 0   ;;  %s2663_s10 = smov 0  }
   0xe   :  { %s2665_s11 = smov 0   ;;  %s2667_s12 = smov 0  }
   0xf   :  { %s2669_s13 = smov 0   ;;  %s2671_s14 = smov 0  }
  0x10   :  { %s2673_s15 = smov 0   ;;  %s2675_s16 = smov 0  }
  0x11 LB: > { %3515 = sst [smem:[#allocation14_spill]] %s2566_s30  ;;  %s1925_s17 = sadd.s32 4294967295, %s2594_s16   ;;  %s2594_s16 = sphi %s2675_s16, %s32_s16   ;;  %s2590_s15 = sphi %s2673_s15, %s3549_s15   ;;  %s2586_s14 = sphi %s2671_s14, %s3548_s14   ;;  %s2582_s13 = sphi %s2669_s13, %s3547_s13   ;;  %s2578_s12 = sphi %s2667_s12, %s3546_s12   ;;  %s2574_s11 = sphi %s2665_s11, %s3541_s11   ;;  %s2570_s10 = sphi %s2663_s10, %s3545_s10   ;;  %s2566_s30 = sphi %s2661_s30, %s3544_s30  }
  0x12   : > { %3516 = sst [smem:[#allocation15_spill]] %s2574_s11  ;;  %s1926_s18 = sadd.s32 4294967294, %s2594_s16  }
  0x13   : > { %s41_s19 = sadd.s32 1, %s2586_s14  ;;  %s44_s20 = sadd.s32 1, %s2590_s15 }
  0x14   : > { %p42_p0 = scmp.ge.s32.totalorder %s41_s19, 2  ;;  %s53_s21 = sadd.s32 1, %s2574_s11 }
  0x15   : > { %p60_p1 = scmp.ne.s32.totalorder %s2574_s11, %s2570_s10  ;;  %p61_p2 = scmp.eq.s32.totalorder %s2594_s16, 0 }
  0x16   : > { %s3551_s19 = smov (%p42_p0, %s41_s19), 0  ;;  %s3553_s20 = smov (!%p42_p0, %s44_s20), %s2590_s15 }
  0x17   : > { %3517 = sst [smem:[#allocation16_spill]] %s3551_s19  ;;  %s49_s22 = ssub.s32 %s2586_s14, %s3551_s19 }
  0x18   : > { %p2714_p3 = por %p61_p2, %p60_p1  ;;  %p46_p4 = scmp.ge.s32.totalorder %s3553_s20, 2 }
  0x19   : > { %p66_p5 = scmp.ne.s32.totalorder %s2570_s10, %s2566_s30  ;;  %p67_p6 = scmp.eq.s32.totalorder %s1925_s17, 0 }
  0x1a   : > { %p258_p7 = scmp.eq.s32.totalorder %s1925_s17, 3  ;;  %s3555_s20 = smov (%p46_p4, %s3553_s20), 0 }
  0x1b   : > { %3519 = sst [smem:[#allocation17_spill]] %s3555_s20  ;;  %p2722_p8 = por %p67_p6, %p66_p5 }
  0x1c   : > { %p2726_p9 = por %p258_p7, %p60_p1  ;;  %s48_s26 = ssub.s32 %s2590_s15, %s3555_s20 }
  0x1d   : > { %s3520_s24 = scalar_select %p2722_p8, 1, 0 }
  0x1e   : > { %s3521_s25 = scalar_select %p2726_p9, 1, 0 }
  0x1f   : > { %p264_p10 = scmp.eq.s32.totalorder %s1926_s18, 3  ;;  %s50_s27 = sor.u32 %s49_s22, %s48_s26 }
  0x20   : > { %3522 = sst [smem:[#allocation18_spill]] %s3521_s25  ;;  %p51_p11 = scmp.eq.s32.totalorder %s50_s27, 0 }
  0x21   : > { %p2732_p12 = por %p264_p10, %p66_p5  ;;  %p2124_p13 = scmp.lt.s32.totalorder %s2594_s16, 4 }
  0x22   : > { %s2738_s29 = sand.u32 1, %s2574_s11   ;;  %s1930_s30 = sshll.u32 %s2586_s14, 3 }
  0x23   : > { %s3523_s28 = scalar_select %p2732_p12, 1, 0 }
  0x24   : > { %s2741_s17 = scalar_select %p51_p11, %s2574_s11, %s53_s21  }
  0x25   : > { %3524 = sst [smem:[#allocation19_spill]] %s3523_s28  ;;  %s1929_s19 = sshll.u32 %s2738_s29, 7 }
  0x26   : > { %3525 = sst [smem:[#allocation20_spill]] %s2741_s17  ;;  %s1931_s9 = sshll.u32 %s2590_s15, 5 }
  0x27   : > { %s328_s20 = scalar_lea.vmem [#allocation2], %s1929_s19  ;;  %s334_s18 = sadd.s32 %s1931_s9, %s1930_s30 }
  0x28   : > { %s337_s25 = sshll.u32 %s328_s20, 4  ;;  %s1932_s22 = sshll.u32 %s334_s18, 7  ;;  %s2748_s25 = int_to_ptr.vmem [resolvable:$true] %s337_s25 }
  0x29   : > { %p2752_p0 = pnand %p2124_p13, %p2714_p3  ;;  %s3527_s0 = sld [smem:[#allocation21_spill]] }
  0x2a   : > { %s325_s9 = scalar_lea.sflag [#allocation3], %s2738_s29 }
  0x2b   : > { %p2402_p3 = pneg %p2752_p0 }
  0x2f   : > { %s2759_s21 = scalar_lea.hbm %s3527_s0, %s1932_s22  ;;  %s2405_s28 = scalar_lea.hbm %s3527_s0, 8192 }
  0x30   : > { %s2400_s19 = scalar_lea.hbm %s2759_s21, 2048  ;;  %p2406_p6 = scmp.lt.u32.totalorder %s2759_s21, %s3527_s0 }
  0x31   : > { %p2401_p2 = scmp.ne.s32.totalorder %s2759_s21, %s2400_s19  ;;  %p2407_p7 = scmp.lt.u32.totalorder %s2405_s28, %s2400_s19 }
  0x32   : > { %p2409_p11 = scmp.lt.u32.totalorder %s2400_s19, %s2759_s21 }
  0x33   : > { %p2403_p4 = pnand %p2402_p3, %p2401_p2  ;;  %p2408_p10 = por %p2407_p7, %p2406_p6 }
  0x35   : > { %p2404_p5 = pneg %p2403_p4  ;;  %p2410_p13 = por %p2409_p11, %p2408_p10 }
  0x37   : > { %p2411_p1 = pnand %p2410_p13, %p2404_p5 }
  0x39   : > { %2414 = shalt.err (!%p2411_p1)
}
  0x3a   : > { %s2415_s27 = scalar_lea.vmem %s2748_s25, 2048  ;;  %s2596_s20 = smov [#allocation2]  }
  0x3b   : > { %p2416_p2 = scmp.ne.s32.totalorder %s2748_s25, %s2415_s27  ;;  %s2420_s23 = sshll.u32 %s2596_s20, 4  ;;  %s2421_s23 = int_to_ptr.vmem [resolvable:$false] %s2420_s23 }
  0x3c   : > { %s2422_s18 = scalar_lea.vmem %s2421_s23, 4096  ;;  %p2423_p9 = scmp.lt.s32.totalorder %s2748_s25, %s2421_s23 }
  0x3d   : > { %p2418_p4 = pnand %p2416_p2, %p2402_p3  ;;  %p2424_p6 = scmp.lt.s32.totalorder %s2422_s18, %s2415_s27 }
  0x3f   : > { %p2419_p12 = pneg %p2418_p4  ;;  %p2425_p7 = por %p2424_p6, %p2423_p9 }
  0x41   : > { %p2426_p10 = pnand %p2425_p7, %p2419_p12 }
  0x43   : > { %2429 = shalt.err (!%p2426_p10)
}
  0x44   : > { %s2597_s19 = smov 2048   ;;  %s2598_s28 = smov 1024  }
  0x45   : > { %s2599_s22 = smov 64   ;;  %p388_p9 = scmp.lt.s32.totalorder %s2594_s16, 5 }
  0x46   : > { %2113 = dma.hbm_to_vmem [thread:$0]  (!%p2752_p0), %s2759_s21, 2048, %s2748_s25, %s325_s9, %s2597_s19, %s2598_s28, %s2599_s22  }
  0x47   : > { %s1933_s27 = sshll.u32 %s2738_s29, 8  ;;  %s1935_s20 = sshll.u32 %s2590_s15, 6 }
  0x48   : > { %p3528_p12 = scmp.ge.s32.totalorder %s2594_s16, 1  ;;  %s357_s18 = sadd.s32 %s1935_s20, %s1930_s30 }
  0x49   : > { %s351_s0 = scalar_lea.vmem [#allocation5], %s1933_s27  ;;  %s1936_s11 = sshll.u32 %s357_s18, 7 }
  0x4a   : > { %p2798_p1 = pnand %p3528_p12, %p388_p9  ;;  %s360_s17 = sshll.u32 %s351_s0, 4  ;;  %s2804_s17 = int_to_ptr.vmem [resolvable:$true] %s360_s17 }
  0x4b   : > { %s2809_s4 = scalar_lea.hbm %s3488_s1, %s1936_s11  ;;  %s348_s25 = scalar_lea.sflag [#allocation6], %s2738_s29 }
  0x4c   : > { %s2430_s21 = scalar_lea.hbm %s2809_s4, 4096  ;;  %s2435_s9 = scalar_lea.hbm %s3488_s1, 16384 }
  0x4d   : > { %p2431_p5 = scmp.ne.s32.totalorder %s2809_s4, %s2430_s21  ;;  %p2436_p2 = scmp.lt.u32.totalorder %s2809_s4, %s3488_s1 }
  0x4e   : > { %p2437_p4 = scmp.lt.u32.totalorder %s2435_s9, %s2430_s21  ;;  %p2439_p7 = scmp.lt.u32.totalorder %s2430_s21, %s2809_s4 }
  0x4f   : > { %p2433_p11 = pnand %p2431_p5, %p2402_p3 }
  0x50   : > { %p2438_p6 = por %p2437_p4, %p2436_p2 }
  0x51   : > { %p2434_p13 = pneg %p2433_p11 }
  0x52   : > { %p2440_p10 = por %p2439_p7, %p2438_p6 }
  0x54   : > { %p2441_p9 = pnand %p2440_p10, %p2434_p13 }
  0x56   : > { %2444 = shalt.err (!%p2441_p9)
}
  0x57   : > { %s2445_s5 = scalar_lea.vmem %s2804_s17, 4096  ;;  %s2600_s8 = smov [#allocation5]  }
  0x58   : > { %p2446_p12 = scmp.ne.s32.totalorder %s2804_s17, %s2445_s5  ;;  %s2450_s11 = sshll.u32 %s2600_s8, 4  ;;  %s2451_s11 = int_to_ptr.vmem [resolvable:$false] %s2450_s11 }
  0x59   : > { %s2452_s18 = scalar_lea.vmem %s2451_s11, 8192  ;;  %p2453_p8 = scmp.lt.s32.totalorder %s2804_s17, %s2451_s11 }
  0x5a   : > { %p2448_p5 = pnand %p2446_p12, %p2402_p3  ;;  %p2454_p2 = scmp.lt.s32.totalorder %s2452_s18, %s2445_s5 }
  0x5c   : > { %p2449_p11 = pneg %p2448_p5  ;;  %p2455_p4 = por %p2454_p2, %p2453_p8 }
  0x5e   : > { %p2456_p6 = pnand %p2455_p4, %p2449_p11 }
  0x60   : > { %2459 = shalt.err (!%p2456_p6)
}
  0x61   : > { %2116 = dma.hbm_to_vmem [thread:$0]  (!%p2752_p0), %s2809_s4, 4096, %s2804_s17, %s348_s25, %s2597_s19, %s2598_s28, %s2599_s22  }
  0x62   : > { %392 = sbr.rel (%p2798_p1) target bundleno = 941 (0x3ad), region = 52  ;;  %s2843_s21 = sand.u32 (!%p2798_p1), 1, %s2570_s10  }
  0x63   : > { %s2846_s0 = sshll.u32 (!%p2798_p1), %s2843_s21, 7  ;;  %s395_s26 = scalar_lea.sflag (!%p2798_p1), [#allocation3], %s2843_s21 }
  0x64   : > { %s2850_s30 = scalar_lea.vmem (!%p2798_p1), [#allocation2], %s2846_s0  ;;  %p3530_p8 = scmp.ne.s32.totalorder (!%p2798_p1), %s3520_s24, 0 }
  0x69   : > { %2549 = dma.done.wait (%p3530_p8), %s395_s26, 2048  }
  0x6a   : > { %2551 = vsyncadd (%p3530_p8), %s395_s26, 4294965248  ;;  %s1939_s4 = sshll.u32 %s2843_s21, 8  ;;  %s404_s29 = scalar_lea.sflag [#allocation6], %s2843_s21 }
  0x6b   : > { %s2858_s17 = scalar_lea.vmem [#allocation5], %s1939_s4 }
  0x6c   : > { %2553 = dma.done.wait (%p3530_p8), %s404_s29, 4096  }
  0x6d   : > { %2555 = vsyncadd (%p3530_p8), %s404_s29, 4294963200  ;;  %p468_p0 = scmp.lt.s32.totalorder %s2582_s13, 1  ;;  %v2601_v0 = vmov 0   ;;  %v484_v3 = vld [vmem:[%s2850_s30] sm:$0xff]  ;;  %v485_v4 = vld [vmem:[%s2850_s30 + $0x8] sm:$0xff]  ;;  %s2602_s25 = smov 4  }
  0x6e   : > { %2201 = vset.pattern.permute.xlu0 %v2601_v0  ;;  %2287 = vset.pattern.permute.xlu1 %v2601_v0  ;;  %v486_v6 = vld [vmem:[%s2850_s30 + $0x10] sm:$0xff]  ;;  %v487_v7 = vld [vmem:[%s2850_s30 + $0x18] sm:$0xff]  ;;  %v492_v10 = vld [vmem:[%s2850_s30 + $0x40] sm:$0xff]  ;;  %p475_p3 = scmp.lt.s32.totalorder %s2578_s12, 1  ;;  %s2603_s9 = smov 124   ;;  %v2604_v56 = vmov 0.0  }
  0x6f   : > { %s2866_s19 = scalar_select %p468_p0, %s2582_s13, 1  ;;  %v493_v11 = vld [vmem:[%s2850_s30 + $0x48] sm:$0xff]  ;;  %v494_v12 = vld [vmem:[%s2850_s30 + $0x50] sm:$0xff]  ;;  %v495_v16 = vld [vmem:[%s2850_s30 + $0x58] sm:$0xff]  ;;  %821 = vmatprep.mubr.f32.mxu0 %v2604_v56  ;;  %910 = vmatprep.mubr.f32.mxu1 %v2604_v56  ;;  %vm578_vm0 = vcmask 31744   ;;  %vm643_vm1 = vcmask 1014784  }
  0x70   : > { %v499_v17 = vld [vmem:[%s2850_s30 + $0x78] sm:$0xff]  ;;  %v497_v18 = vld [vmem:[%s2850_s30 + $0x68] sm:$0xff]  ;;  %v496_v20 = vld [vmem:[%s2850_s30 + $0x60] sm:$0xff]  ;;  %s476_s27 = scalar_select %p475_p3, %s2578_s12, 1  ;;  %vm744_vm2 = vcmask 654336   ;;  %vm1269_vm3 = vcmask 130048  }
  0x71   : > { %s2005_s28 = sshll.u32 %s2866_s19, 4  ;;  %v498_v21 = vld [vmem:[%s2850_s30 + $0x70] sm:$0xff]  ;;  %v488_v24 = vld [vmem:[%s2850_s30 + $0x20] sm:$0xff]  ;;  %v491_v25 = vld [vmem:[%s2850_s30 + $0x38] sm:$0xff]  ;;  %s1945_s20 = sshll.u32 %s2866_s19, 2 }
  0x72   : > { %s472_s23 = scalar_lea.vmem %s3489_s2, %s2005_s28  ;;  %v489_v26 = vld [vmem:[%s2850_s30 + $0x28] sm:$0xff]  ;;  %v490_v29 = vld [vmem:[%s2850_s30 + $0x30] sm:$0xff]  ;;  %s1944_s5 = sshll.u32 %s476_s27, 1 }
  0x73   : > { %v500_v1 = vld [vmem:[%s472_s23] sm:$0xff]  ;;  %v501_v2 = vld [vmem:[%s472_s23 + $0x8] sm:$0xff]  ;;  %s479_s8 = sadd.s32 %s1945_s20, %s1944_s5  ;;  %s2605_s29 = smov 120  }
  0x74   : > { %504 = vperm.xlu0 %2201, %v500_v1   ;;  %s1946_s11 = sshll.u32 %s479_s8, 3  ;;  %v721_v0 = vld [vmem:[%s3493_s6 + $0x8] sm:$0xff]  ;;  %v723_v1 = vld [vmem:[%s3493_s6 + $0x18] sm:$0xff]  ;;  %s3531_s22 = sld [smem:[#allocation22_spill]] }
  0x75   : > { %s481_s4 = scalar_lea.vmem %s3490_s3, %s1946_s11  ;;  %s3532_s8 = sld [smem:[#allocation23_spill]] }
  0x76   : > { %v528_v59 = vld [vmem:[%s481_s4] sm:$0xff]  ;;  %v529_v60 = vld [vmem:[%s481_s4 + $0x8] sm:$0xff]  ;;  %s3299_s28 = scalar_lea.vmem [#allocation7], %s2846_s0  ;;  %s3317_s24 = scalar_lea.vmem [#allocation8], %s2846_s0 }
  0x77   : > { %v2282_v63 = vpack.i.bf16 %v529_v60, %v528_v59  ;;  %s1997_s0 = sshll.u32 %s2578_s12, 3  ;;  %s1998_s23 = sshll.u32 %s2582_s13, 5 }
  0x78   : > { %509 = vperm.xlu0 %2201, %v501_v2   ;;  %v1246_v2 = vld [vmem:[%s3494_s7 + $0x8] sm:$0xff]  ;;  %s3348_s12 = sadd.s32 %s1998_s23, %s1997_s0  ;;  %s1723_s13 = sshll.u32 %s3299_s28, 4  ;;  %s3366_s13 = int_to_ptr.vmem [resolvable:$true] %s1723_s13 }
  0x79   : > { %s3533_s20 = sld [smem:[#allocation24_spill]]  ;;  %s1741_s5 = sshll.u32 %s3317_s24, 4  ;;  %s3428_s5 = int_to_ptr.vmem [resolvable:$true] %s1741_s5 }
  0x7a   : > { %s1703_s11 = scalar_lea.sflag [#allocation4], %s2843_s21  ;;  %s2460_s18 = scalar_lea.vmem %s3366_s13, 2048 }
  0x7b   : > { %p2461_p1 = scmp.ne.s32.totalorder %s3366_s13, %s2460_s18  ;;  %s2606_s26 = smov [#allocation7]  }
  0x7c   : > { %s2464_s4 = sshll.u32 %s2606_s26, 4  ;;  %s2465_s4 = int_to_ptr.vmem [resolvable:$false] %s2464_s4 }
  0x7d   : > { %p2467_p9 = scmp.lt.s32.totalorder %s3366_s13, %s2465_s4 }
  0xf3   : > { %v505_v5 = vpop.permute.xlu0 %504 }
  0xf4   : > { %v2876_v8 = vadd.f32 %v505_v5, %v484_v3  ;;  %v2878_v9 = vadd.f32 %v505_v5, %v485_v4  ;;  %v2885_v14 = vadd.f32 %v505_v5, %v486_v6  ;;  %v2887_v15 = vadd.f32 %v505_v5, %v487_v7  ;;  %v1248_v3 = vld [vmem:[%s3494_s7 + $0x18] sm:$0xff]  ;;  %v720_v4 = vld [vmem:[%s3493_s6] sm:$0xff]  ;;  %v1247_v7 = vld [vmem:[%s3494_s7 + $0x10] sm:$0xff] }
  0xf5   : > { %v2919_v36 = vadd.f32 %v505_v5, %v488_v24  ;;  %v2921_v37 = vadd.f32 %v505_v5, %v491_v25  ;;  %v2923_v38 = vadd.f32 %v505_v5, %v489_v26  ;;  %v2927_v39 = vadd.f32 %v505_v5, %v490_v29  ;;  %v722_v5 = vld [vmem:[%s3493_s6 + $0x10] sm:$0xff]  ;;  %v1245_v6 = vld [vmem:[%s3494_s7] sm:$0xff] }
  0xf6   : > { %v2202_v13 = vpack.i.bf16 %v2878_v9, %v2876_v8  ;;  %v2207_v33 = vpack.i.bf16 %v2887_v15, %v2885_v14  ;;  %v2222_v46 = vpack.i.bf16 %v2885_v14, %v2878_v9 }
  0xf7   : > { %v510_v19 = vpop.permute.xlu0 %509  ;;  %v2227_v51 = vpack.i.bf16 %v2919_v36, %v2887_v15  ;;  %v2252_v54 = vpack.i.bf16 %v2921_v37, %v2927_v39  ;;  %v2247_v55 = vpack.i.bf16 %v2923_v38, %v2919_v36  ;;  %v2267_v62 = vpack.i.bf16 %v2927_v39, %v2923_v38 }
  0xf8   : > { %2203 = vrot.lane.b32.xlu1 %v2202_v13, %s2602_s25  ;;  %v2895_v22 = vadd.f32 %v510_v19, %v492_v10  ;;  %v2897_v23 = vadd.f32 %v510_v19, %v493_v11  ;;  %v2902_v27 = vadd.f32 %v510_v19, %v494_v12  ;;  %v2904_v28 = vadd.f32 %v510_v19, %v495_v16 }
  0xf9   : > { %v2907_v30 = vadd.f32 %v510_v19, %v499_v17  ;;  %v2909_v31 = vadd.f32 %v510_v19, %v497_v18  ;;  %v2915_v34 = vadd.f32 %v510_v19, %v496_v20  ;;  %v2917_v35 = vadd.f32 %v510_v19, %v498_v21 }
  0xfa   : > { %v2212_v32 = vpack.i.bf16 %v2897_v23, %v2895_v22  ;;  %v2010_v40 = vpack.c.bf16 %v2897_v23, %v2878_v9  ;;  %v2012_v41 = vpack.c.bf16 %v2895_v22, %v2876_v8  ;;  %v2030_v42 = vpack.c.bf16 %v2904_v28, %v2887_v15 }
  0xfb   : > { %v2032_v43 = vpack.c.bf16 %v2902_v27, %v2885_v14  ;;  %v2050_v44 = vpack.c.bf16 %v2909_v31, %v2923_v38  ;;  %v2070_v45 = vpack.c.bf16 %v2907_v30, %v2921_v37  ;;  %v2217_v47 = vpack.i.bf16 %v2904_v28, %v2902_v27 }
  0xfc   : > { %2213 = vrot.lane.b32.xlu0 %v2212_v32, %s2602_s25  ;;  %2208 = vrot.lane.b32.xlu1 %v2207_v33, %s2602_s25  ;;  %v2052_v48 = vpack.c.bf16 %v2915_v34, %v2919_v36  ;;  %v2072_v49 = vpack.c.bf16 %v2917_v35, %v2927_v39  ;;  %v2232_v50 = vpack.i.bf16 %v2902_v27, %v2897_v23  ;;  %v690_v36 = vld [vmem:[%s2858_s17 + $0x30] sm:$0xff]  ;;  %v707_v39 = vld [vmem:[%s2858_s17 + $0xb8] sm:$0xff] }
  0xfd   : > { %v2242_v52 = vpack.i.bf16 %v2895_v22, %v2876_v8  ;;  %v2237_v53 = vpack.i.bf16 %v2915_v34, %v2904_v28  ;;  %v2262_v57 = vpack.i.bf16 %v2907_v30, %v2917_v35  ;;  %v2257_v58 = vpack.i.bf16 %v2909_v31, %v2915_v34  ;;  %v689_v30 = vld [vmem:[%s2858_s17 + $0x28] sm:$0xff]  ;;  %v696_v34 = vld [vmem:[%s2858_s17 + $0x60] sm:$0xff] }
  0xfe   : > { %v2272_v61 = vpack.i.bf16 %v2909_v31, %v2921_v37  ;;  %v697_v37 = vld [vmem:[%s2858_s17 + $0x68] sm:$0xff] }
 0x100   : > { %2223 = vrot.lane.b32.xlu0 %v2222_v46, %s2603_s9  ;;  %2218 = vrot.lane.b32.xlu1 %v2217_v47, %s2602_s25 }
 0x104   : > { %2233 = vrot.lane.b32.xlu0 %v2232_v50, %s2603_s9  ;;  %2228 = vrot.lane.b32.xlu1 %v2227_v51, %s2603_s9 }
 0x108   : > { %2243 = vrot.lane.b32.xlu0 %v2242_v52, %s2603_s9  ;;  %2238 = vrot.lane.b32.xlu1 %v2237_v53, %s2603_s9 }
 0x10c   : > { %2253 = vrot.lane.b32.xlu0 %v2252_v54, %s2602_s25  ;;  %2248 = vrot.lane.b32.xlu1 %v2247_v55, %s2602_s25 }
 0x110   : > { %2263 = vrot.lane.b32.xlu0 %v2262_v57, %s2602_s25  ;;  %2258 = vrot.lane.b32.xlu1 %v2257_v58, %s2602_s25  ;;  %s1999_s25 = sshll.u32 %s3348_s12, 7 }
 0x114   : > { %2273 = vrot.lane.b32.xlu0 %v2272_v61, %s2603_s9  ;;  %2268 = vrot.lane.b32.xlu1 %v2267_v62, %s2603_s9 }
 0x118   : > { %2283 = vrot.lane.b32.xlu0 %v2282_v63, %s2605_s29  ;;  %2278 = vrot.lane.b32.xlu1 %v2262_v57, %s2603_s9  ;;  %s3376_s9 = scalar_lea.hbm %s3533_s20, %s1999_s25  ;;  %s2466_s29 = scalar_lea.vmem %s2465_s4, 4096 }
 0x119   : > { %p2468_p12 = scmp.lt.s32.totalorder %s2466_s29, %s2460_s18 }
 0x11b   : > { %p2469_p5 = por %p2468_p12, %p2467_p9 }
 0x11c   : > { %731 = vperm.xlu0 %2201, %v721_v0   ;;  %726 = vperm.xlu1 %2287, %v720_v4  }
 0x120   : > { %741 = vperm.xlu0 %2201, %v723_v1   ;;  %736 = vperm.xlu1 %2287, %v722_v5  }
 0x124   : > { %1256 = vperm.xlu0 %2201, %v1246_v2   ;;  %1251 = vperm.xlu1 %2287, %v1245_v6   ;;  %v693_v2 = vld [vmem:[%s2858_s17 + $0x48] sm:$0xff] }
 0x128   : > { %1266 = vperm.xlu0 %2201, %v1248_v3   ;;  %1261 = vperm.xlu1 %2287, %v1247_v7   ;;  %v687_v7 = vld [vmem:[%s2858_s17 + $0x18] sm:$0xff] }
 0x16a   : > { %v2204_v10 = vpop.permute.xlu1 %2203 }
 0x16b   : > { %v2206_v11 = vunpack.i.h.bf16 %v2204_v10  ;;  %v2205_v12 = vunpack.i.l.bf16 %v2204_v10  ;;  %v695_v10 = vld [vmem:[%s2858_s17 + $0x58] sm:$0xff] }
 0x16d   : > { %v579_v21 = vsel %vm578_vm0, %v2205_v12, %v2206_v11  ;;  %v609_v25 = vsel %vm578_vm0, %v528_v59, %v2205_v12 }
 0x16e   : > { %v2214_v13 = vpop.permute.xlu0 %2213  ;;  %v3014_v16 = vpop.permute.xlu1 %2208 }
 0x16f   : > { %v2216_v17 = vunpack.i.h.bf16 %v2214_v13  ;;  %v2215_v18 = vunpack.i.l.bf16 %v2214_v13  ;;  %v2211_v19 = vunpack.i.h.bf16 %v3014_v16  ;;  %v2210_v20 = vunpack.i.l.bf16 %v3014_v16  ;;  %v3106_v16 = vld [vmem:[%s3531_s22 + $0x8] sm:$0xff] }
 0x171   : > { %v586_v24 = vsel %vm578_vm0, %v2215_v18, %v2216_v17  ;;  %v610_v26 = vsel %vm578_vm0, %v529_v60, %v2215_v18  ;;  %v581_v51 = vsel %vm578_vm0, %v2210_v20, %v2211_v19  ;;  %v580_v52 = vsel %vm578_vm0, %v2206_v11, %v2210_v20  ;;  %v684_v18 = vld [vmem:[%s2858_s17] sm:$0xff] }
 0x172   : > { %v2224_v29 = vpop.permute.xlu0 %2223  ;;  %v3022_v32 = vpop.permute.xlu1 %2218  ;;  %v2006_v33 = vpack.c.bf16 %v586_v24, %v579_v21  ;;  %v2008_v46 = vpack.c.bf16 %v610_v26, %v609_v25  ;;  %v692_v20 = vld [vmem:[%s2858_s17 + $0x40] sm:$0xff]  ;;  %v686_v21 = vld [vmem:[%s2858_s17 + $0x10] sm:$0xff]  ;;  %v2038_v26 = vpack.c.bf16 %v695_v10, %v687_v7 }
 0x173   : > { %v2221_v47 = vunpack.i.h.bf16 %v3022_v32  ;;  %v2220_v50 = vunpack.i.l.bf16 %v3022_v32  ;;  %v2226_v53 = vunpack.i.h.bf16 %v2224_v29  ;;  %v2225_v54 = vunpack.i.l.bf16 %v2224_v29  ;;  %v694_v29 = vld [vmem:[%s2858_s17 + $0x50] sm:$0xff] }
 0x174   : > { %2007 = vmatprep.subr.bf16.mxu0 %v2006_v33  ;;  %v701_v33 = vld [vmem:[%s2858_s17 + $0x88] sm:$0xff] }
 0x175   : > { %2009 = vmatpush1.bf16.msra.mxu0 %v2008_v46  ;;  %v588_v55 = vsel %vm578_vm0, %v2220_v50, %v2221_v47  ;;  %v587_v57 = vsel %vm578_vm0, %v2216_v17, %v2220_v50  ;;  %v645_v9 = vsel %vm643_vm1, %v2225_v54, %v2226_v53  ;;  %v709_v46 = vld [vmem:[%s2858_s17 + $0xc8] sm:$0xff]  ;;  %v703_v50 = vld [vmem:[%s2858_s17 + $0x98] sm:$0xff] }
 0x176   : > { %v2234_v58 = vpop.permute.xlu0 %2233  ;;  %v3034_v59 = vpop.permute.xlu1 %2228  ;;  %2011 = vmatprep.subr.bf16.mxu0 %v2010_v40  ;;  %v2026_v60 = vpack.c.bf16 %v588_v55, %v581_v51  ;;  %v2028_v61 = vpack.c.bf16 %v587_v57, %v580_v52  ;;  %v685_v40 = vld [vmem:[%s2858_s17 + $0x8] sm:$0xff]  ;;  %v711_v51 = vld [vmem:[%s2858_s17 + $0xd8] sm:$0xff]  ;;  %v2020_v52 = vpack.c.bf16 %v692_v20, %v684_v18  ;;  %v2040_v55 = vpack.c.bf16 %v694_v29, %v686_v21  ;;  %v3093_v20 = vld [vmem:[%s3531_s22] sm:$0xff] }
 0x177   : > { %v2236_v62 = vunpack.i.h.bf16 %v2234_v58  ;;  %v2235_v63 = vunpack.i.l.bf16 %v2234_v58  ;;  %v2231_v0 = vunpack.i.h.bf16 %v3034_v59  ;;  %v2230_v1 = vunpack.i.l.bf16 %v3034_v59  ;;  %v700_v58 = vld [vmem:[%s2858_s17 + $0x80] sm:$0xff]  ;;  %v718_v59 = vld [vmem:[%s3531_s22 + $0x10] sm:$0xff] }
 0x178   : > { %2027 = vmatprep.subr.bf16.mxu1 %v2026_v60  ;;  %v2018_v28 = vpack.c.bf16 %v693_v2, %v685_v40  ;;  %v2022_v57 = vpack.c.bf16 %v709_v46, %v701_v33  ;;  %v708_v60 = vld [vmem:[%s2858_s17 + $0xc0] sm:$0xff]  ;;  %v710_v40 = vld [vmem:[%s2858_s17 + $0xd0] sm:$0xff] }
 0x179   : > { %2013 = vmatpush1.bf16.msra.mxu0 %v2012_v41  ;;  %2029 = vmatpush1.bf16.msra.mxu1 %v2028_v61  ;;  %v652_v23 = vsel %vm643_vm1, %v2235_v63, %v2236_v62  ;;  %v647_v11 = vsel %vm643_vm1, %v2230_v1, %v2231_v0  ;;  %v646_v15 = vsel %vm643_vm1, %v2226_v53, %v2230_v1 }
 0x17a   : > { %v2244_v3 = vpop.permute.xlu0 %2243  ;;  %v3048_v4 = vpop.permute.xlu1 %2238  ;;  %2031 = vmatprep.subr.bf16.mxu1 %v2030_v42  ;;  %v2014_v5 = vpack.c.bf16 %v652_v23, %v645_v9  ;;  %v2042_v9 = vpack.c.bf16 %v711_v51, %v703_v50  ;;  %v702_v23 = vld [vmem:[%s2858_s17 + $0x90] sm:$0xff] }
 0x17b   : > { %v2246_v6 = vunpack.i.h.bf16 %v2244_v3  ;;  %v2245_v8 = vunpack.i.l.bf16 %v2244_v3  ;;  %v2241_v22 = vunpack.i.h.bf16 %v3048_v4  ;;  %v2240_v41 = vunpack.i.l.bf16 %v3048_v4  ;;  %v699_v4 = vld [vmem:[%s2858_s17 + $0x78] sm:$0xff] }
 0x17c   : > { %2015 = vmatprep.subr.bf16.mxu0 %v2014_v5 }
 0x17d   : > { %2033 = vmatpush1.bf16.msra.mxu1 %v2032_v43  ;;  %v644_v42 = vsel %vm643_vm1, %v2245_v8, %v2225_v54  ;;  %v651_v12 = vsel %vm643_vm1, %v2246_v6, %v2235_v63  ;;  %v654_v13 = vsel %vm643_vm1, %v2240_v41, %v2241_v22  ;;  %v653_v17 = vsel %vm643_vm1, %v2236_v62, %v2240_v41 }
 0x17e   : > { %v2254_v24 = vpop.permute.xlu0 %2253  ;;  %v2249_v14 = vpop.permute.xlu1 %2248  ;;  %v2016_v27 = vpack.c.bf16 %v651_v12, %v644_v42  ;;  %v2034_v43 = vpack.c.bf16 %v654_v13, %v647_v11  ;;  %v2036_v25 = vpack.c.bf16 %v653_v17, %v646_v15  ;;  %v2024_v8 = vpack.c.bf16 %v708_v60, %v700_v58  ;;  %v698_v60 = vld [vmem:[%s2858_s17 + $0x70] sm:$0xff] }
 0x17f   : > { %v2251_v53 = vunpack.i.h.bf16 %v2249_v14  ;;  %v2250_v54 = vunpack.i.l.bf16 %v2249_v14  ;;  %v2256_v61 = vunpack.i.h.bf16 %v2254_v24  ;;  %v2255_v62 = vunpack.i.l.bf16 %v2254_v24 }
 0x180   : > { %2017 = vmatpush1.bf16.msra.mxu0 %v2016_v27  ;;  %2035 = vmatprep.subr.bf16.mxu1 %v2034_v43  ;;  %v2044_v41 = vpack.c.bf16 %v710_v40, %v702_v23  ;;  %v2058_v58 = vpack.c.bf16 %v697_v37, %v689_v30  ;;  %v2080_v23 = vpack.c.bf16 %v698_v60, %v690_v36 }
 0x181   : > { %2037 = vmatpush1.bf16.msra.mxu1 %v2036_v25  ;;  %2019 = vmatprep.subr.bf16.mxu0 %v2018_v28  ;;  %v583_v7 = vsel %vm578_vm0, %v2250_v54, %v2251_v53  ;;  %v585_v17 = vsel %vm578_vm0, %v2255_v62, %v2256_v61  ;;  %v584_v21 = vsel %vm578_vm0, %v2251_v53, %v2255_v62  ;;  %v705_v61 = vld [vmem:[%s2858_s17 + $0xa8] sm:$0xff] }
 0x182   : > { %v2264_v63 = vpop.permute.xlu0 %2263  ;;  %v2259_v1 = vpop.permute.xlu1 %2258  ;;  %2039 = vmatprep.subr.bf16.mxu1 %v2038_v26  ;;  %v582_v24 = vsel %vm578_vm0, %v2211_v19, %v2250_v54  ;;  %v713_v62 = vld [vmem:[%s2858_s17 + $0xe8] sm:$0xff] }
 0x183   : > { %v2266_v2 = vunpack.i.h.bf16 %v2264_v63  ;;  %v2265_v3 = vunpack.i.l.bf16 %v2264_v63  ;;  %v2261_v5 = vunpack.i.h.bf16 %v2259_v1  ;;  %v2260_v6 = vunpack.i.l.bf16 %v2259_v1  ;;  %v719_v1 = vld [vmem:[%s3531_s22 + $0x18] sm:$0xff] }
 0x184   : > { %2021 = vmatpush1.bf16.msra.mxu0 %v2020_v52  ;;  %v2062_v40 = vpack.c.bf16 %v713_v62, %v705_v61 }
 0x185   : > { %2041 = vmatpush1.bf16.msra.mxu1 %v2040_v55  ;;  %2023 = vmatprep.subr.bf16.mxu0 %v2022_v57  ;;  %v590_v10 = vsel %vm578_vm0, %v2260_v6, %v2261_v5  ;;  %v592_v42 = vsel %vm578_vm0, %v2265_v3, %v2266_v2  ;;  %v591_v12 = vsel %vm578_vm0, %v2261_v5, %v2265_v3  ;;  %v704_v2 = vld [vmem:[%s2858_s17 + $0xa0] sm:$0xff] }
 0x186   : > { %v2274_v11 = vpop.permute.xlu0 %2273  ;;  %v2269_v15 = vpop.permute.xlu1 %2268  ;;  %2043 = vmatprep.subr.bf16.mxu1 %v2042_v9  ;;  %v2046_v28 = vpack.c.bf16 %v590_v10, %v583_v7  ;;  %v589_v13 = vsel %vm578_vm0, %v2221_v47, %v2260_v6  ;;  %v2066_v18 = vpack.c.bf16 %v592_v42, %v585_v17  ;;  %v2068_v27 = vpack.c.bf16 %v591_v12, %v584_v21  ;;  %v712_v3 = vld [vmem:[%s2858_s17 + $0xe0] sm:$0xff]  ;;  %v706_v6 = vld [vmem:[%s2858_s17 + $0xb0] sm:$0xff] }
 0x187   : > { %v2271_v14 = vunpack.i.h.bf16 %v2269_v15  ;;  %v2270_v32 = vunpack.i.l.bf16 %v2269_v15  ;;  %v2048_v47 = vpack.c.bf16 %v589_v13, %v582_v24  ;;  %v2276_v43 = vunpack.i.h.bf16 %v2274_v11 }
 0x188   : > { %2025 = vmatpush1.bf16.msra.mxu0 %v2024_v8  ;;  %v2275_v25 = vunpack.i.l.bf16 %v2274_v11  ;;  %v714_v8 = vld [vmem:[%s2858_s17 + $0xf0] sm:$0xff] }
 0x189   : > { %2045 = vmatpush1.bf16.msra.mxu1 %v2044_v41  ;;  %2047 = vmatprep.subr.bf16.mxu0 %v2046_v28  ;;  %v649_v19 = vsel %vm643_vm1, %v2270_v32, %v2271_v14  ;;  %v655_v31 = vsel %vm643_vm1, %v2241_v22, %v2276_v43  ;;  %v648_v38 = vsel %vm643_vm1, %v2231_v0, %v2270_v32  ;;  %v691_v0 = vld [vmem:[%s2858_s17 + $0x38] sm:$0xff]  ;;  %v688_v22 = vld [vmem:[%s2858_s17 + $0x20] sm:$0xff] }
 0x18a   : > { %v2284_v26 = vpop.permute.xlu0 %2283  ;;  %v2279_v29 = vpop.permute.xlu1 %2278  ;;  %2067 = vmatprep.subr.bf16.mxu1 %v2066_v18  ;;  %v2056_v57 = vpack.c.bf16 %v655_v31, %v648_v38  ;;  %v2078_v35 = vpack.c.bf16 %v699_v4, %v691_v0  ;;  %v2060_v9 = vpack.c.bf16 %v696_v34, %v688_v22  ;;  %v2064_v41 = vpack.c.bf16 %v712_v3, %v704_v2 }
 0x18b   : > { %v2286_v33 = vunpack.i.h.bf16 %v2284_v26  ;;  %v2285_v46 = vunpack.i.l.bf16 %v2284_v26  ;;  %v2281_v50 = vunpack.i.h.bf16 %v2279_v29  ;;  %v2280_v51 = vunpack.i.l.bf16 %v2279_v29  ;;  %1947 = vmatmul.mubr.msk.f32.vlgmr.msra.gmra.mrb[0].mxu0 %vm744_vm2, %v3093_v20 }
 0x18c   : > { %1951 = vmatmul.mubr.msk.f32.vlgmr.msra.gmra.mrb[0].mxu1 %vm744_vm2, %v3093_v20  ;;  %2049 = vmatpush1.bf16.msra.mxu0 %v2048_v47  ;;  %v2084_v7 = vpack.c.bf16 %v714_v8, %v706_v6 }
 0x18d   : > { %2051 = vmatprep.subr.bf16.mxu0 %v2050_v44  ;;  %2069 = vmatpush1.bf16.msra.mxu1 %v2068_v27  ;;  %v656_v52 = vsel %vm643_vm1, %v2276_v43, %v2280_v51  ;;  %v682_v53 = vsel %vm643_vm1, %v2275_v25, %v2285_v46  ;;  %v683_v55 = vsel %vm643_vm1, %v2281_v50, %v2286_v33 }
 0x18e   : > { %827 = vmatprep.mubr.f32.mxu0 %v2604_v56  ;;  %2071 = vmatprep.subr.bf16.mxu1 %v2070_v45  ;;  %v2054_v54 = vpack.c.bf16 %v656_v52, %v649_v19  ;;  %v657_v44 = vsel %vm643_vm1, %v2280_v51, %v2281_v50  ;;  %v2074_v45 = vpack.c.bf16 %v683_v55, %v682_v53 }
 0x18f   : > { %1948 = vmatmul.mubr.msk.f32.gmra.mrb[2].mxu0 %vm744_vm2, %v3106_v16  ;;  %916 = vmatprep.mubr.f32.mxu1 %v2604_v56 }
 0x190   : > { %1952 = vmatmul.mubr.msk.f32.gmra.mrb[2].mxu1 %vm744_vm2, %v3106_v16  ;;  %2053 = vmatpush1.bf16.msra.mxu0 %v2052_v48  ;;  %v650_v48 = vsel %vm643_vm1, %v2271_v14, %v2275_v25 }
 0x191   : > { %2055 = vmatprep.subr.bf16.mxu0 %v2054_v54  ;;  %2073 = vmatpush1.bf16.msra.mxu1 %v2072_v49  ;;  %v2076_v63 = vpack.c.bf16 %v657_v44, %v650_v48  ;;  %v715_v49 = vld [vmem:[%s2858_s17 + $0xf8] sm:$0xff]  ;;  %s3534_s17 = sld [smem:[#allocation18_spill]] }
 0x192   : > { %833 = vmatprep.mubr.f32.mxu0 %v2604_v56  ;;  %2075 = vmatprep.subr.bf16.mxu1 %v2074_v45  ;;  %v2082_v5 = vpack.c.bf16 %v715_v49, %v707_v39 }
 0x193   : > { %1949 = vmatmul.mubr.msk.f32.gmra.mrb[4].mxu0 %vm744_vm2, %v718_v59  ;;  %922 = vmatprep.mubr.f32.mxu1 %v2604_v56 }
 0x194   : > { %1953 = vmatmul.mubr.msk.f32.gmra.mrb[4].mxu1 %vm744_vm2, %v718_v59  ;;  %2057 = vmatpush1.bf16.msra.mxu0 %v2056_v57 }
 0x195   : > { %2077 = vmatpush1.bf16.msra.mxu1 %v2076_v63  ;;  %839 = vmatprep.mubr.f32.mxu0 %v2604_v56 }
 0x196   : > { %928 = vmatprep.mubr.f32.mxu1 %v2604_v56  ;;  %2059 = vmatprep.subr.bf16.mxu0 %v2058_v58 }
 0x197   : > { %1950 = vmatmul.mubr.msk.f32.gmra.mrb[6].mxu0 %vm744_vm2, %v719_v1  ;;  %2079 = vmatprep.subr.bf16.mxu1 %v2078_v35  ;;  %p3535_p13 = scmp.ne.s32.totalorder %s3534_s17, 0 }
 0x198   : > { %1954 = vmatmul.mubr.msk.f32.gmra.mrb[6].mxu1 %vm744_vm2, %v719_v1  ;;  %2061 = vmatpush1.bf16.msra.mxu0 %v2060_v9 }
 0x199   : > { %2081 = vmatpush1.bf16.msra.mxu1 %v2080_v23  ;;  %2063 = vmatprep.subr.bf16.mxu0 %v2062_v40  ;;  %p2462_p7 = pnand %p2461_p1, %p3535_p13 }
 0x19a   : > { %2083 = vmatprep.subr.bf16.mxu1 %v2082_v5  ;;  %999 = vmatprep.mubr.f32.mxu0 %v2604_v56 }
 0x19b   : > { %1088 = vmatprep.mubr.f32.mxu1 %v2604_v56  ;;  %v3190_v10 = vpop.permute.xlu1 %726  ;;  %v3196_v21 = vpop.permute.xlu0 %731  ;;  %p2463_p10 = pneg %p2462_p7 }
 0x19c   : > { %2065 = vmatpush1.bf16.msra.mxu0 %v2064_v41 }
 0x19d   : > { %2085 = vmatpush1.bf16.msra.mxu1 %v2084_v7  ;;  %p2470_p11 = pnand %p2469_p5, %p2463_p10 }
 0x19f   : > { %1955 = vmatmul.mubr.msk.f32.vlgmr.msra.gmra.mrb[8].mxu0 %vm744_vm2, %v3093_v20  ;;  %v3202_v51 = vpop.permute.xlu1 %736  ;;  %v3207_v44 = vpop.permute.xlu0 %741 }
 0x1a0   : > { %1959 = vmatmul.mubr.msk.f32.vlgmr.msra.gmra.mrb[8].mxu1 %vm744_vm2, %v3093_v20  ;;  %1005 = vmatprep.mubr.f32.mxu0 %v2604_v56 }
 0x1a1   : > { %1094 = vmatprep.mubr.f32.mxu1 %v2604_v56 }
 0x1a3   : > { %1956 = vmatmul.mubr.msk.f32.gmra.mrb[10].mxu0 %vm744_vm2, %v3106_v16 }
 0x1a4   : > { %1960 = vmatmul.mubr.msk.f32.gmra.mrb[10].mxu1 %vm744_vm2, %v3106_v16  ;;  %1011 = vmatprep.mubr.f32.mxu0 %v2604_v56 }
 0x1a5   : > { %1100 = vmatprep.mubr.f32.mxu1 %v2604_v56 }
 0x1a7   : > { %1957 = vmatmul.mubr.msk.f32.gmra.mrb[12].mxu0 %vm744_vm2, %v718_v59 }
 0x1a8   : > { %1961 = vmatmul.mubr.msk.f32.gmra.mrb[12].mxu1 %vm744_vm2, %v718_v59  ;;  %1017 = vmatprep.mubr.f32.mxu0 %v2604_v56 }
 0x1a9   : > { %1106 = vmatprep.mubr.f32.mxu1 %v2604_v56 }
 0x1ab   : > { %1958 = vmatmul.mubr.msk.f32.gmra.mrb[14].mxu0 %vm744_vm2, %v719_v1 }
 0x1ac   : > { %1962 = vmatmul.mubr.msk.f32.gmra.mrb[14].mxu1 %vm744_vm2, %v719_v1  ;;  %1346 = vmatprep.mubr.f32.mxu0 %v2604_v56 }
 0x1ad   : > { %1435 = vmatprep.mubr.f32.mxu1 %v2604_v56 }
 0x25e   : > { %v823_v11 = vpop.f32.mrb[0].mxu0 }
 0x25f   : > { %v824_v15 = vadd.f32 %v823_v11, %v3190_v10  ;;  %v825_v28 = vpop.f32.mrb[1].mxu0  ;;  %v912_v42 = vpop.f32.mrb[0].mxu1 }
 0x260   : > { %v826_v12 = vadd.f32 %v825_v28, %v3190_v10  ;;  %v913_v13 = vadd.f32 %v912_v42, %v3190_v10  ;;  %v914_v17 = vpop.f32.mrb[1].mxu1 }
 0x261   : > { %v1963_v18 = vmul.f32 -1.442695, %v824_v15  ;;  %v915_v20 = vadd.f32 %v914_v17, %v3190_v10 }
 0x262   : > { %v1964_v24 = vmul.f32 -1.442695, %v826_v12  ;;  %v1965_v14 = vmul.f32 -1.442695, %v913_v13  ;;  %v829_v32 = vpop.f32.mrb[2].mxu0 }
 0x263   : > { %2288 = vpow2.f32 %v1963_v18  ;;  %v1966_v47 = vmul.f32 -1.442695, %v915_v20  ;;  %v830_v27 = vadd.f32 %v829_v32, %v3196_v21  ;;  %v831_v43 = vpop.f32.mrb[3].mxu0  ;;  %v918_v25 = vpop.f32.mrb[2].mxu1 }
 0x264   : > { %2290 = vpow2.f32 %v1964_v24  ;;  %v832_v26 = vadd.f32 %v831_v43, %v3196_v21  ;;  %v919_v29 = vadd.f32 %v918_v25, %v3196_v21  ;;  %v920_v33 = vpop.f32.mrb[3].mxu1 }
 0x265   : > { %2292 = vpow2.f32 %v1965_v14  ;;  %v1971_v46 = vmul.f32 -1.442695, %v830_v27  ;;  %v921_v50 = vadd.f32 %v920_v33, %v3196_v21 }
 0x266   : > { %2294 = vpow2.f32 %v1966_v47  ;;  %v1972_v16 = vmul.f32 -1.442695, %v832_v26  ;;  %v1973_v19 = vmul.f32 -1.442695, %v919_v29  ;;  %v835_v52 = vpop.f32.mrb[4].mxu0 }
 0x267   : > { %2296 = vpow2.f32 %v1971_v46  ;;  %v1974_v53 = vmul.f32 -1.442695, %v921_v50  ;;  %v836_v54 = vadd.f32 %v835_v52, %v3202_v51  ;;  %v924_v55 = vpop.f32.mrb[4].mxu1  ;;  %v837_v31 = vpop.f32.mrb[5].mxu0 }
 0x268   : > { %2298 = vpow2.f32 %v1972_v16  ;;  %v925_v38 = vadd.f32 %v924_v55, %v3202_v51  ;;  %v926_v30 = vpop.f32.mrb[5].mxu1  ;;  %v838_v37 = vadd.f32 %v837_v31, %v3202_v51 }
 0x269   : > { %2300 = vpow2.f32 %v1973_v19  ;;  %v927_v45 = vadd.f32 %v926_v30, %v3202_v51 }
 0x26a   : > { %2302 = vpow2.f32 %v1974_v53  ;;  %v841_v59 = vpop.f32.mrb[6].mxu0 }
 0x26b   : > { %2304 = vtanh.f32 %v836_v54  ;;  %v842_v0 = vadd.f32 %v841_v59, %v3207_v44  ;;  %v843_v4 = vpop.f32.mrb[7].mxu0  ;;  %v930_v22 = vpop.f32.mrb[6].mxu1 }
 0x26c   : > { %2306 = vtanh.f32 %v925_v38  ;;  %v932_v34 = vpop.f32.mrb[7].mxu1  ;;  %v844_v8 = vadd.f32 %v843_v4, %v3207_v44  ;;  %v931_v28 = vadd.f32 %v930_v22, %v3207_v44 }
 0x26d   : > { %v2289_v36 = vpop.eup %2288  ;;  %2308 = vtanh.f32 %v838_v37  ;;  %v933_v13 = vadd.f32 %v932_v34, %v3207_v44 }
 0x26e   : > { %v2291_v48 = vpop.eup %2290  ;;  %v1161_v57 = vadd.f32 1.0, %v2289_v36  ;;  %2310 = vtanh.f32 %v927_v45 }
 0x26f   : > { %v2293_v58 = vpop.eup %2292  ;;  %v1162_v60 = vadd.f32 1.0, %v2291_v48  ;;  %2312 = vtanh.f32 %v842_v0 }
 0x270   : > { %v2295_v61 = vpop.eup %2294  ;;  %2314 = vrcp.f32 %v1161_v57  ;;  %v1163_v62 = vadd.f32 1.0, %v2293_v58 }
 0x271   : > { %v2297_v63 = vpop.eup %2296  ;;  %2316 = vrcp.f32 %v1162_v60  ;;  %v1164_v35 = vadd.f32 1.0, %v2295_v61 }
 0x272   : > { %v2299_v39 = vpop.eup %2298  ;;  %2318 = vrcp.f32 %v1163_v62  ;;  %v1169_v49 = vadd.f32 1.0, %v2297_v63  ;;  %v1001_v1 = vpop.f32.mrb[8].mxu0 }
 0x273   : > { %v2301_v9 = vpop.eup %2300  ;;  %2320 = vrcp.f32 %v1164_v35  ;;  %v1170_v23 = vadd.f32 1.0, %v2299_v39  ;;  %v1002_v40 = vadd.f32 %v1001_v1, %v3190_v10  ;;  %v1003_v2 = vpop.f32.mrb[9].mxu0 }
 0x274   : > { %v1090_v3 = vpop.f32.mrb[8].mxu1  ;;  %v2303_v5 = vpop.eup %2302  ;;  %2322 = vrcp.f32 %v1169_v49  ;;  %v1171_v6 = vadd.f32 1.0, %v2301_v9  ;;  %v1004_v41 = vadd.f32 %v1003_v2, %v3190_v10 }
 0x275   : > { %v1092_v7 = vpop.f32.mrb[9].mxu1  ;;  %v2305_v11 = vpop.eup %2304  ;;  %2324 = vrcp.f32 %v1170_v23  ;;  %v1172_v15 = vadd.f32 1.0, %v2303_v5  ;;  %v1091_v42 = vadd.f32 %v1090_v3, %v3190_v10  ;;  %v1967_v24 = vmul.f32 -1.442695, %v1002_v40 }
 0x276   : > { %v2307_v12 = vpop.eup %2306  ;;  %2326 = vrcp.f32 %v1171_v6  ;;  %v1093_v17 = vadd.f32 %v1092_v7, %v3190_v10  ;;  %v1007_v18 = vpop.f32.mrb[10].mxu0  ;;  %v1968_v43 = vmul.f32 -1.442695, %v1004_v41 }
 0x277   : > { %v2309_v20 = vpop.eup %2308  ;;  %2328 = vrcp.f32 %v1172_v15  ;;  %v1008_v14 = vadd.f32 %v1007_v18, %v3196_v21  ;;  %v1009_v32 = vpop.f32.mrb[11].mxu0  ;;  %v1969_v33 = vmul.f32 -1.442695, %v1091_v42  ;;  %v3230_v18 = vld [vmem:[%s3532_s8] sm:$0xff] }
 0x278   : > { %v1096_v47 = vpop.f32.mrb[10].mxu1  ;;  %v2311_v27 = vpop.eup %2310  ;;  %2330 = vtanh.f32 %v844_v8  ;;  %v1010_v25 = vadd.f32 %v1009_v32, %v3196_v21  ;;  %v1970_v50 = vmul.f32 -1.442695, %v1093_v17 }
 0x279   : > { %v1098_v26 = vpop.f32.mrb[11].mxu1  ;;  %v2313_v29 = vpop.eup %2312  ;;  %2332 = vtanh.f32 %v931_v28  ;;  %v1097_v46 = vadd.f32 %v1096_v47, %v3196_v21  ;;  %v1975_v53 = vmul.f32 -1.442695, %v1008_v14 }
 0x27a   : > { %v2315_v10 = vpop.eup %2314  ;;  %2334 = vtanh.f32 %v933_v13  ;;  %v1099_v16 = vadd.f32 %v1098_v26, %v3196_v21  ;;  %v1013_v19 = vpop.f32.mrb[12].mxu0  ;;  %v1976_v30 = vmul.f32 -1.442695, %v1010_v25 }
 0x27b   : > { %v2317_v52 = vpop.eup %2316  ;;  %2336 = vpow2.f32 %v1967_v24  ;;  %v1015_v54 = vpop.f32.mrb[13].mxu0  ;;  %v1225_v31 = vmul.f32 %v2315_v10, %v2305_v11  ;;  %v1977_v0 = vmul.f32 -1.442695, %v1097_v46  ;;  %v1014_v57 = vadd.f32 %v1013_v19, %v3202_v51 }
 0x27c   : > { %v1102_v55 = vpop.f32.mrb[12].mxu1  ;;  %v2319_v38 = vpop.eup %2318  ;;  %2338 = vpow2.f32 %v1968_v43  ;;  %v1226_v45 = vmul.f32 %v2317_v52, %v2309_v20  ;;  %v1978_v34 = vmul.f32 -1.442695, %v1099_v16  ;;  %v1016_v63 = vadd.f32 %v1015_v54, %v3202_v51 }
 0x27d   : > { %v1104_v37 = vpop.f32.mrb[13].mxu1  ;;  %v2321_v59 = vpop.eup %2320  ;;  %2340 = vpow2.f32 %v1969_v33  ;;  %v1227_v4 = vmul.f32 %v2319_v38, %v2307_v12  ;;  %v1103_v49 = vadd.f32 %v1102_v55, %v3202_v51 }
 0x27e   : > { %v2323_v22 = vpop.eup %2322  ;;  %2342 = vpow2.f32 %v1970_v50  ;;  %v1019_v21 = vpop.f32.mrb[14].mxu0  ;;  %v1228_v36 = vmul.f32 %v2321_v59, %v2311_v27  ;;  %v1105_v23 = vadd.f32 %v1104_v37, %v3202_v51 }
 0x27f   : > { %v2325_v48 = vpop.eup %2324  ;;  %2344 = vpow2.f32 %v1975_v53  ;;  %v1021_v58 = vpop.f32.mrb[15].mxu0  ;;  %v1233_v61 = vmul.f32 %v2323_v22, %v2313_v29  ;;  %v1020_v2 = vadd.f32 %v1019_v21, %v3207_v44  ;;  %v3239_v29 = vld [vmem:[%s3532_s8 + $0x8] sm:$0xff]  ;;  %v1243_v53 = vld [vmem:[%s3532_s8 + $0x10] sm:$0xff] }
 0x280   : > { %v1108_v60 = vpop.f32.mrb[14].mxu1  ;;  %v2327_v62 = vpop.eup %2326  ;;  %2346 = vpow2.f32 %v1976_v30  ;;  %v1022_v26 = vadd.f32 %v1021_v58, %v3207_v44  ;;  %v1244_v30 = vld [vmem:[%s3532_s8 + $0x18] sm:$0xff] }
 0x281   : > { %v1110_v35 = vpop.f32.mrb[15].mxu1  ;;  %v2329_v39 = vpop.eup %2328  ;;  %2348 = vpow2.f32 %v1977_v0  ;;  %v2088_v1 = vpack.c.bf16 %v1233_v61, %v1225_v31  ;;  %v1109_v10 = vadd.f32 %v1108_v60, %v3207_v44 }
 0x282   : > { %v2331_v9 = vpop.eup %2330  ;;  %2350 = vpow2.f32 %v1978_v34  ;;  %v1111_v16 = vadd.f32 %v1110_v35, %v3207_v44 }
 0x283   : > { %v2333_v40 = vpop.eup %2332  ;;  %2352 = vtanh.f32 %v1014_v57  ;;  %v1234_v3 = vmul.f32 %v2331_v9, %v2325_v48 }
 0x284   : > { %v2335_v5 = vpop.eup %2334  ;;  %2354 = vtanh.f32 %v1016_v63  ;;  %v1235_v6 = vmul.f32 %v2333_v40, %v2327_v62 }
 0x285   : > { %v2337_v8 = vpop.eup %2336  ;;  %2356 = vtanh.f32 %v1103_v49  ;;  %v2086_v41 = vpack.c.bf16 %v1234_v3, %v1226_v45  ;;  %v1236_v7 = vmul.f32 %v2335_v5, %v2329_v39  ;;  %v2384_v5 = vld [vmem:[%s2850_s30] sm:$0xff] }
 0x286   : > { %v2339_v11 = vpop.eup %2338  ;;  %v1165_v15 = vadd.f32 1.0, %v2337_v8  ;;  %2358 = vtanh.f32 %v1105_v23  ;;  %v2092_v28 = vpack.c.bf16 %v1235_v6, %v1227_v4 }
 0x287   : > { %v2341_v42 = vpop.eup %2340  ;;  %v1166_v12 = vadd.f32 1.0, %v2339_v11  ;;  %2360 = vtanh.f32 %v1020_v2  ;;  %2087 = vmatprep.subr.bf16.mxu0 %v2086_v41  ;;  %v2090_v51 = vpack.c.bf16 %v1236_v7, %v1228_v36  ;;  %v3290_v41 = vpop.permute.xlu0 %1256  ;;  %v2385_v7 = vld [vmem:[%s2850_s30 + $0x8] sm:$0xff] }
 0x288   : > { %v2343_v13 = vpop.eup %2342  ;;  %2362 = vrcp.f32 %v1165_v15  ;;  %v1167_v17 = vadd.f32 1.0, %v2341_v42  ;;  %2089 = vmatpush1.bf16.msra.mxu0 %v2088_v1  ;;  %v3284_v1 = vpop.permute.xlu1 %1251 }
 0x289   : > { %v2345_v20 = vpop.eup %2344  ;;  %2364 = vrcp.f32 %v1166_v12  ;;  %v1168_v24 = vadd.f32 1.0, %v2343_v13  ;;  %2091 = vmatprep.subr.bf16.mxu1 %v2090_v51  ;;  %v2386_v12 = vld [vmem:[%s2850_s30 + $0x10] sm:$0xff] }
 0x28a   : > { %v2347_v14 = vpop.eup %2346  ;;  %2366 = vrcp.f32 %v1167_v17  ;;  %v1173_v32 = vadd.f32 1.0, %v2345_v20  ;;  %2093 = vmatpush1.bf16.msra.mxu1 %v2092_v28  ;;  %v2387_v20 = vld [vmem:[%s2850_s30 + $0x18] sm:$0xff] }
 0x28b   : > { %v2349_v47 = vpop.eup %2348  ;;  %2368 = vrcp.f32 %v1168_v24  ;;  %v1174_v27 = vadd.f32 1.0, %v2347_v14  ;;  %1979 = vmatmul.mubr.msk.f32.vlgmr.msra.gmra.mrb[16].mxu0 %vm1269_vm3, %v3230_v18 }
 0x28c   : > { %v2351_v43 = vpop.eup %2350  ;;  %2370 = vrcp.f32 %v1173_v32  ;;  %v1175_v25 = vadd.f32 1.0, %v2349_v47  ;;  %1352 = vmatprep.mubr.f32.mxu0 %v2604_v56 }
 0x28d   : > { %v2353_v33 = vpop.eup %2352  ;;  %2372 = vrcp.f32 %v1174_v27  ;;  %v1176_v46 = vadd.f32 1.0, %v2351_v43  ;;  %1983 = vmatmul.mubr.msk.f32.vlgmr.msra.gmra.mrb[16].mxu1 %vm1269_vm3, %v3230_v18  ;;  %v2388_v27 = vld [vmem:[%s2850_s30 + $0x40] sm:$0xff] }
 0x28e   : > { %v2355_v50 = vpop.eup %2354  ;;  %2374 = vrcp.f32 %v1175_v25  ;;  %1441 = vmatprep.mubr.f32.mxu1 %v2604_v56 }
 0x28f   : > { %v2357_v19 = vpop.eup %2356  ;;  %2376 = vrcp.f32 %v1176_v46  ;;  %1980 = vmatmul.mubr.msk.f32.gmra.mrb[18].mxu0 %vm1269_vm3, %v3239_v29  ;;  %v2389_v46 = vld [vmem:[%s2850_s30 + $0x48] sm:$0xff] }
 0x290   : > { %v2359_v52 = vpop.eup %2358  ;;  %2378 = vtanh.f32 %v1022_v26  ;;  %1358 = vmatprep.mubr.f32.mxu0 %v2604_v56 }
 0x291   : > { %v2361_v54 = vpop.eup %2360  ;;  %2380 = vtanh.f32 %v1109_v10  ;;  %1984 = vmatmul.mubr.msk.f32.gmra.mrb[18].mxu1 %vm1269_vm3, %v3239_v29 }
 0x292   : > { %v2363_v44 = vpop.eup %2362  ;;  %2382 = vtanh.f32 %v1111_v16  ;;  %1447 = vmatprep.mubr.f32.mxu1 %v2604_v56 }
 0x293   : > { %v2365_v55 = vpop.eup %2364  ;;  %1981 = vmatmul.mubr.msk.f32.gmra.mrb[20].mxu0 %vm1269_vm3, %v1243_v53  ;;  %v1229_v31 = vmul.f32 %v2363_v44, %v2353_v33 }
 0x294   : > { %v2367_v38 = vpop.eup %2366  ;;  %1364 = vmatprep.mubr.f32.mxu0 %v2604_v56  ;;  %v1230_v37 = vmul.f32 %v2365_v55, %v2355_v50 }
 0x295   : > { %v2369_v45 = vpop.eup %2368  ;;  %1985 = vmatmul.mubr.msk.f32.gmra.mrb[20].mxu1 %vm1269_vm3, %v1243_v53  ;;  %v1231_v59 = vmul.f32 %v2367_v38, %v2357_v19 }
 0x296   : > { %v2371_v0 = vpop.eup %2370  ;;  %1453 = vmatprep.mubr.f32.mxu1 %v2604_v56  ;;  %v1232_v4 = vmul.f32 %v2369_v45, %v2359_v52  ;;  %v2390_v52 = vld [vmem:[%s2850_s30 + $0x50] sm:$0xff] }
 0x297   : > { %v2373_v22 = vpop.eup %2372  ;;  %1982 = vmatmul.mubr.msk.f32.gmra.mrb[22].mxu0 %vm1269_vm3, %v1244_v30  ;;  %v1237_v34 = vmul.f32 %v2371_v0, %v2361_v54 }
 0x298   : > { %v2375_v21 = vpop.eup %2374  ;;  %1524 = vmatprep.mubr.f32.mxu0 %v2604_v56 }
 0x299   : > { %v2377_v36 = vpop.eup %2376  ;;  %1986 = vmatmul.mubr.msk.f32.gmra.mrb[22].mxu1 %vm1269_vm3, %v1244_v30  ;;  %v2096_v48 = vpack.c.bf16 %v1237_v34, %v1229_v31  ;;  %v2391_v31 = vld [vmem:[%s2850_s30 + $0x58] sm:$0xff] }
 0x29a   : > { %v2379_v57 = vpop.eup %2378  ;;  %1613 = vmatprep.mubr.f32.mxu1 %v2604_v56 }
 0x29b   : > { %v2381_v58 = vpop.eup %2380  ;;  %v1238_v60 = vmul.f32 %v2379_v57, %v2373_v22 }
 0x29c   : > { %v2383_v61 = vpop.eup %2382  ;;  %v1239_v62 = vmul.f32 %v2381_v58, %v2375_v21 }
 0x29d   : > { %v2094_v63 = vpack.c.bf16 %v1238_v60, %v1230_v37  ;;  %v1240_v35 = vmul.f32 %v2383_v61, %v2377_v36 }
 0x29e   : > { %v2100_v39 = vpack.c.bf16 %v1239_v62, %v1231_v59 }
 0x29f   : > { %2095 = vmatprep.subr.bf16.mxu0 %v2094_v63  ;;  %v2098_v49 = vpack.c.bf16 %v1240_v35, %v1232_v4  ;;  %v3321_v4 = vpop.permute.xlu0 %1266 }
 0x2a0   : > { %2097 = vmatpush1.bf16.msra.mxu0 %v2096_v48 }
 0x2a1   : > { %2099 = vmatprep.subr.bf16.mxu1 %v2098_v49 }
 0x2a2   : > { %2101 = vmatpush1.bf16.msra.mxu1 %v2100_v39 }
 0x2a3   : > { %1987 = vmatmul.mubr.msk.f32.vlgmr.msra.gmra.mrb[24].mxu0 %vm1269_vm3, %v3230_v18 }
 0x2a4   : > { %1530 = vmatprep.mubr.f32.mxu0 %v2604_v56 }
 0x2a5   : > { %1991 = vmatmul.mubr.msk.f32.vlgmr.msra.gmra.mrb[24].mxu1 %vm1269_vm3, %v3230_v18 }
 0x2a6   : > { %1619 = vmatprep.mubr.f32.mxu1 %v2604_v56 }
 0x2a7   : > { %1988 = vmatmul.mubr.msk.f32.gmra.mrb[26].mxu0 %vm1269_vm3, %v3239_v29 }
 0x2a8   : > { %1536 = vmatprep.mubr.f32.mxu0 %v2604_v56 }
 0x2a9   : > { %1992 = vmatmul.mubr.msk.f32.gmra.mrb[26].mxu1 %vm1269_vm3, %v3239_v29  ;;  %v3304_v29 = vpop.permute.xlu1 %1261 }
 0x2aa   : > { %1625 = vmatprep.mubr.f32.mxu1 %v2604_v56 }
 0x2ab   : > { %1989 = vmatmul.mubr.msk.f32.gmra.mrb[28].mxu0 %vm1269_vm3, %v1243_v53 }
 0x2ac   : > { %1542 = vmatprep.mubr.f32.mxu0 %v2604_v56 }
 0x2ad   : > { %1993 = vmatmul.mubr.msk.f32.gmra.mrb[28].mxu1 %vm1269_vm3, %v1243_v53 }
 0x2ae   : > { %1631 = vmatprep.mubr.f32.mxu1 %v2604_v56 }
 0x2af   : > { %1990 = vmatmul.mubr.msk.f32.gmra.mrb[30].mxu0 %vm1269_vm3, %v1244_v30 }
 0x2b1   : > { %1994 = vmatmul.mubr.msk.f32.gmra.mrb[30].mxu1 %vm1269_vm3, %v1244_v30 }
 0x35e   : > { %v1348_v9 = vpop.f32.mrb[16].mxu0 }
 0x35f   : > { %v1349_v23 = vadd.f32 %v1348_v9, %v3284_v1  ;;  %v1350_v40 = vpop.f32.mrb[17].mxu0 }
 0x360   : > { %v1351_v2 = vadd.f32 %v1350_v40, %v3284_v1  ;;  %v1437_v3 = vpop.f32.mrb[16].mxu1 }
 0x361   : > { %v1638_v6 = vadd.f32 %v2384_v5, %v1349_v23  ;;  %v1438_v8 = vadd.f32 %v1437_v3, %v3284_v1  ;;  %v1439_v56 = vpop.f32.mrb[17].mxu1  ;;  %v2392_v23 = vld [vmem:[%s2850_s30 + $0x20] sm:$0xff]  ;;  %v2393_v5 = vld [vmem:[%s2850_s30 + $0x28] sm:$0xff] }
 0x362   : > { %v1639_v11 = vadd.f32 %v2385_v7, %v1351_v2  ;;  %v1440_v15 = vadd.f32 %v1439_v56, %v3284_v1  ;;  %v1354_v28 = vpop.f32.mrb[18].mxu0 }
 0x363   : > { %v1654_v42 = vmul.f32 0.70710677, %v1638_v6  ;;  %v1640_v51 = vadd.f32 %v2386_v12, %v1438_v8  ;;  %v1355_v13 = vadd.f32 %v1354_v28, %v3290_v41  ;;  %v1356_v17 = vpop.f32.mrb[19].mxu0 }
 0x364   : > { %v1655_v18 = vmul.f32 0.70710677, %v1639_v11  ;;  %v1641_v24 = vadd.f32 %v2387_v20, %v1440_v15  ;;  %v1357_v14 = vadd.f32 %v1356_v17, %v3290_v41  ;;  %v1443_v32 = vpop.f32.mrb[18].mxu1  ;;  %v2394_v11 = vld [vmem:[%s2850_s30 + $0x30] sm:$0xff]  ;;  %v2396_v20 = vld [vmem:[%s2850_s30 + $0x60] sm:$0xff] }
 0x365   : > { %1670 = vst [vmem:[%s3299_s28] sm:$0xff] %v1654_v42  ;;  %v1656_v47 = vmul.f32 0.70710677, %v1640_v51  ;;  %v1646_v43 = vadd.f32 %v2388_v27, %v1355_v13  ;;  %v1444_v25 = vadd.f32 %v1443_v32, %v3290_v41  ;;  %v1445_v26 = vpop.f32.mrb[19].mxu1  ;;  %v2395_v51 = vld [vmem:[%s2850_s30 + $0x38] sm:$0xff]  ;;  %v2397_v27 = vld [vmem:[%s2850_s30 + $0x68] sm:$0xff] }
 0x366   : > { %1671 = vst [vmem:[%s3299_s28 + $0x8] sm:$0xff] %v1655_v18  ;;  %v1657_v33 = vmul.f32 0.70710677, %v1641_v24  ;;  %v1647_v10 = vadd.f32 %v2389_v46, %v1357_v14  ;;  %v1446_v50 = vadd.f32 %v1445_v26, %v3290_v41  ;;  %v1360_v16 = vpop.f32.mrb[20].mxu0  ;;  %v2398_v46 = vld [vmem:[%s2850_s30 + $0x70] sm:$0xff] }
 0x367   : > { %1672 = vst [vmem:[%s3299_s28 + $0x10] sm:$0xff] %v1656_v47  ;;  %v1662_v19 = vmul.f32 0.70710677, %v1646_v43  ;;  %v1648_v53 = vadd.f32 %v2390_v52, %v1444_v25  ;;  %v1361_v54 = vadd.f32 %v1360_v16, %v3304_v29  ;;  %v1362_v44 = vpop.f32.mrb[21].mxu0  ;;  %v2399_v52 = vld [vmem:[%s2850_s30 + $0x78] sm:$0xff] }
 0x368   : > { %1673 = vst [vmem:[%s3299_s28 + $0x18] sm:$0xff] %v1657_v33  ;;  %v1663_v55 = vmul.f32 0.70710677, %v1647_v10  ;;  %v1649_v38 = vadd.f32 %v2391_v31, %v1446_v50  ;;  %v1363_v30 = vadd.f32 %v1362_v44, %v3304_v29  ;;  %v1449_v37 = vpop.f32.mrb[20].mxu1 }
 0x369   : > { %1678 = vst [vmem:[%s3299_s28 + $0x40] sm:$0xff] %v1662_v19  ;;  %v1664_v45 = vmul.f32 0.70710677, %v1648_v53  ;;  %1686 = vst [vmem:[%s3317_s24] sm:$0xff] %v1361_v54  ;;  %v1450_v59 = vadd.f32 %v1449_v37, %v3304_v29  ;;  %v1451_v0 = vpop.f32.mrb[21].mxu1 }
 0x36a   : > { %1679 = vst [vmem:[%s3299_s28 + $0x48] sm:$0xff] %v1663_v55  ;;  %v1665_v22 = vmul.f32 0.70710677, %v1649_v38  ;;  %1687 = vst [vmem:[%s3317_s24 + $0x8] sm:$0xff] %v1363_v30  ;;  %v1452_v34 = vadd.f32 %v1451_v0, %v3304_v29  ;;  %v1366_v21 = vpop.f32.mrb[22].mxu0 }
 0x36b   : > { %1680 = vst [vmem:[%s3299_s28 + $0x50] sm:$0xff] %v1664_v45  ;;  %1688 = vst [vmem:[%s3317_s24 + $0x10] sm:$0xff] %v1450_v59  ;;  %v1367_v36 = vadd.f32 %v1366_v21, %v3321_v4  ;;  %v1368_v48 = vpop.f32.mrb[23].mxu0 }
 0x36c   : > { %1681 = vst [vmem:[%s3299_s28 + $0x58] sm:$0xff] %v1665_v22  ;;  %1689 = vst [vmem:[%s3317_s24 + $0x18] sm:$0xff] %v1452_v34  ;;  %v1369_v57 = vadd.f32 %v1368_v48, %v3321_v4  ;;  %v1455_v58 = vpop.f32.mrb[22].mxu1 }
 0x36d   : > { %1694 = vst [vmem:[%s3317_s24 + $0x40] sm:$0xff] %v1367_v36  ;;  %v1456_v60 = vadd.f32 %v1455_v58, %v3321_v4  ;;  %v1457_v61 = vpop.f32.mrb[23].mxu1 }
 0x36e   : > { %1695 = vst [vmem:[%s3317_s24 + $0x48] sm:$0xff] %v1369_v57  ;;  %v1458_v62 = vadd.f32 %v1457_v61, %v3321_v4 }
 0x36f   : > { %1696 = vst [vmem:[%s3317_s24 + $0x50] sm:$0xff] %v1456_v60 }
 0x370   : > { %1697 = vst [vmem:[%s3317_s24 + $0x58] sm:$0xff] %v1458_v62 }
 0x376   : > { %v1526_v63 = vpop.f32.mrb[24].mxu0 }
 0x377   : > { %v1527_v35 = vadd.f32 %v1526_v63, %v3284_v1  ;;  %v1528_v39 = vpop.f32.mrb[25].mxu0 }
 0x378   : > { %v1529_v49 = vadd.f32 %v1528_v39, %v3284_v1  ;;  %v1615_v9 = vpop.f32.mrb[24].mxu1 }
 0x379   : > { %v1642_v40 = vadd.f32 %v2392_v23, %v1527_v35  ;;  %v1616_v2 = vadd.f32 %v1615_v9, %v3284_v1  ;;  %v1617_v3 = vpop.f32.mrb[25].mxu1 }
 0x37a   : > { %v1643_v6 = vadd.f32 %v2393_v5, %v1529_v49  ;;  %v1618_v8 = vadd.f32 %v1617_v3, %v3284_v1  ;;  %v1532_v56 = vpop.f32.mrb[26].mxu0 }
 0x37b   : > { %v1658_v7 = vmul.f32 0.70710677, %v1642_v40  ;;  %v1644_v15 = vadd.f32 %v2394_v11, %v1616_v2  ;;  %v1533_v28 = vadd.f32 %v1532_v56, %v3290_v41  ;;  %v1534_v42 = vpop.f32.mrb[27].mxu0 }
 0x37c   : > { %v1659_v12 = vmul.f32 0.70710677, %v1643_v6  ;;  %v1645_v13 = vadd.f32 %v2395_v51, %v1618_v8  ;;  %v1535_v17 = vadd.f32 %v1534_v42, %v3290_v41  ;;  %v1621_v1 = vpop.f32.mrb[26].mxu1 }
 0x37d   : > { %1674 = vst [vmem:[%s3299_s28 + $0x20] sm:$0xff] %v1658_v7  ;;  %v1660_v18 = vmul.f32 0.70710677, %v1644_v15  ;;  %v1650_v24 = vadd.f32 %v2396_v20, %v1533_v28  ;;  %v1622_v14 = vadd.f32 %v1621_v1, %v3290_v41  ;;  %v1623_v32 = vpop.f32.mrb[27].mxu1 }
 0x37e   : > { %1675 = vst [vmem:[%s3299_s28 + $0x28] sm:$0xff] %v1659_v12  ;;  %v1661_v47 = vmul.f32 0.70710677, %v1645_v13  ;;  %v1651_v43 = vadd.f32 %v2397_v27, %v1535_v17  ;;  %v1624_v25 = vadd.f32 %v1623_v32, %v3290_v41  ;;  %v1538_v26 = vpop.f32.mrb[28].mxu0 }
 0x37f   : > { %1676 = vst [vmem:[%s3299_s28 + $0x30] sm:$0xff] %v1660_v18  ;;  %v1666_v33 = vmul.f32 0.70710677, %v1650_v24  ;;  %v1652_v10 = vadd.f32 %v2398_v46, %v1622_v14  ;;  %v1539_v50 = vadd.f32 %v1538_v26, %v3304_v29  ;;  %v1540_v16 = vpop.f32.mrb[29].mxu0 }
 0x380   : > { %1677 = vst [vmem:[%s3299_s28 + $0x38] sm:$0xff] %v1661_v47  ;;  %v1667_v19 = vmul.f32 0.70710677, %v1651_v43  ;;  %v1653_v53 = vadd.f32 %v2399_v52, %v1624_v25  ;;  %v1541_v41 = vadd.f32 %v1540_v16, %v3304_v29  ;;  %v1627_v54 = vpop.f32.mrb[28].mxu1 }
 0x381   : > { %1682 = vst [vmem:[%s3299_s28 + $0x60] sm:$0xff] %v1666_v33  ;;  %v1668_v44 = vmul.f32 0.70710677, %v1652_v10  ;;  %1690 = vst [vmem:[%s3317_s24 + $0x20] sm:$0xff] %v1539_v50  ;;  %v1628_v55 = vadd.f32 %v1627_v54, %v3304_v29  ;;  %v1629_v31 = vpop.f32.mrb[29].mxu1 }
 0x382   : > { %1683 = vst [vmem:[%s3299_s28 + $0x68] sm:$0xff] %v1667_v19  ;;  %v1669_v38 = vmul.f32 0.70710677, %v1653_v53  ;;  %1691 = vst [vmem:[%s3317_s24 + $0x28] sm:$0xff] %v1541_v41  ;;  %v1630_v30 = vadd.f32 %v1629_v31, %v3304_v29  ;;  %v1544_v37 = vpop.f32.mrb[30].mxu0 }
 0x383   : > { %1684 = vst [vmem:[%s3299_s28 + $0x70] sm:$0xff] %v1668_v44  ;;  %1692 = vst [vmem:[%s3317_s24 + $0x30] sm:$0xff] %v1628_v55  ;;  %v1545_v45 = vadd.f32 %v1544_v37, %v3321_v4  ;;  %v1546_v59 = vpop.f32.mrb[31].mxu0 }
 0x384   : > { %1685 = vst [vmem:[%s3299_s28 + $0x78] sm:$0xff] %v1669_v38  ;;  %1693 = vst [vmem:[%s3317_s24 + $0x38] sm:$0xff] %v1630_v30  ;;  %v1547_v0 = vadd.f32 %v1546_v59, %v3321_v4  ;;  %v1633_v22 = vpop.f32.mrb[30].mxu1 }
 0x385   : > { %1698 = vst [vmem:[%s3317_s24 + $0x60] sm:$0xff] %v1545_v45  ;;  %v1634_v34 = vadd.f32 %v1633_v22, %v3321_v4  ;;  %v1635_v21 = vpop.f32.mrb[31].mxu1 }
 0x386   : > { %2473 = shalt.err (!%p2470_p11)
}
 0x387   : > { %s2474_s19 = scalar_lea.hbm %s3376_s9, 2048  ;;  %s2478_s23 = scalar_lea.hbm %s3533_s20, 8192 }
 0x388   : > { %p2475_p2 = scmp.ne.s32.totalorder %s3376_s9, %s2474_s19  ;;  %p2479_p8 = scmp.lt.u32.totalorder %s3376_s9, %s3533_s20 }
 0x389   : > { %p2480_p0 = scmp.lt.u32.totalorder %s2478_s23, %s2474_s19  ;;  %p2482_p1 = scmp.lt.u32.totalorder %s2474_s19, %s3376_s9 }
 0x38a   : > { %p2476_p4 = pnand %p2475_p2, %p3535_p13 }
 0x38b   : > { %p2481_p3 = por %p2480_p0, %p2479_p8 }
 0x38c   : > { %p2477_p6 = pneg %p2476_p4 }
 0x38d   : > { %p2483_p7 = por %p2482_p1, %p2481_p3 }
 0x38f   : > { %p2484_p10 = pnand %p2483_p7, %p2477_p6 }
 0x391   : > { %2487 = shalt.err (!%p2484_p10)
}
 0x392   : > { %s2607_s18 = smov 1024   ;;  %s2608_s26 = smov 2048   ;;  %1699 = vst [vmem:[%s3317_s24 + $0x68] sm:$0xff] %v1547_v0  ;;  %v1636_v29 = vadd.f32 %v1635_v21, %v3321_v4  ;;  %1700 = vst [vmem:[%s3317_s24 + $0x70] sm:$0xff] %v1634_v34 }
 0x393   : > { %s2609_s4 = smov 64   ;;  %s3536_s28 = sld [smem:[#allocation25_spill]] }
 0x394   : > { %2106 = dma.vmem_to_hbm [thread:$0]  (%p3535_p13), %s3366_s13, 2048, %s3376_s9, %s1703_s11, %s2607_s18, %s2608_s26, %s2609_s4  }
 0x395   : > { %1701 = vst [vmem:[%s3317_s24 + $0x78] sm:$0xff] %v1636_v29  ;;  %s1708_s23 = scalar_lea.sflag [#allocation9], %s2843_s21  ;;  %s2488_s27 = scalar_lea.vmem %s3428_s5, 2048 }
 0x396   : > { %p2489_p9 = scmp.ne.s32.totalorder %s3428_s5, %s2488_s27  ;;  %s2610_s12 = smov [#allocation8]  }
 0x397   : > { %s2492_s13 = sshll.u32 %s2610_s12, 4  ;;  %s2493_s13 = int_to_ptr.vmem [resolvable:$false] %s2492_s13 }
 0x398   : > { %p2490_p12 = pnand %p2489_p9, %p3535_p13  ;;  %s2494_s9 = scalar_lea.vmem %s2493_s13, 4096 }
 0x399   : > { %s3424_s0 = scalar_lea.hbm %s3536_s28, %s1999_s25  ;;  %p2495_p11 = scmp.lt.s32.totalorder %s3428_s5, %s2493_s13 }
 0x39a   : > { %p2491_p5 = pneg %p2490_p12  ;;  %p2496_p2 = scmp.lt.s32.totalorder %s2494_s9, %s2488_s27 }
 0x39c   : > { %p2497_p4 = por %p2496_p2, %p2495_p11 }
 0x39e   : > { %p2498_p6 = pnand %p2497_p4, %p2491_p5 }
 0x3a0   : > { %2501 = shalt.err (!%p2498_p6)
}
 0x3a1   : > { %s2502_s24 = scalar_lea.hbm %s3424_s0, 2048  ;;  %s2506_s30 = scalar_lea.hbm %s3536_s28, 8192 }
 0x3a2   : > { %p2503_p8 = scmp.ne.s32.totalorder %s3424_s0, %s2502_s24  ;;  %p2507_p1 = scmp.lt.u32.totalorder %s3424_s0, %s3536_s28 }
 0x3a3   : > { %p2508_p7 = scmp.lt.u32.totalorder %s2506_s30, %s2502_s24  ;;  %p2510_p9 = scmp.lt.u32.totalorder %s2502_s24, %s3424_s0 }
 0x3a4   : > { %p2504_p0 = pnand %p2503_p8, %p3535_p13 }
 0x3a5   : > { %p2509_p10 = por %p2508_p7, %p2507_p1 }
 0x3a6   : > { %p2505_p3 = pneg %p2504_p0 }
 0x3a7   : > { %p2511_p12 = por %p2510_p9, %p2509_p10 }
 0x3a9   : > { %p2512_p5 = pnand %p2511_p12, %p2505_p3 }
 0x3ab   : > { %2515 = shalt.err (!%p2512_p5)
}
 0x3ac   : > { %2107 = dma.vmem_to_hbm [thread:$0]  (%p3535_p13), %s3428_s5, 2048, %s3424_s0, %s1708_s23, %s2607_s18, %s2608_s26, %s2609_s4  }
 0x3ad PF: > { %s3537_s27 = sld [smem:[#allocation14_spill]]  ;;  %s3538_s12 = sld [smem:[#allocation19_spill]] }
 0x3ae   : > { %p2125_p11 = scmp.ge.s32.totalorder %s2594_s16, 2 }
 0x3b3   : > { %s1756_s13 = sand.u32 1, %s3537_s27   ;;  %p3539_p2 = scmp.ne.s32.totalorder %s3538_s12, 0 }
 0x3b4   : > { %s1757_s9 = scalar_lea.sflag [#allocation4], %s1756_s13 }
 0x3b5   : > { %p2118_p4 = pnand %p2125_p11, %p3539_p2 }
 0x3b7   : > { %2557 = dma.done.wait (!%p2118_p4), %s1757_s9, 2048  }
 0x3b8   : > { %2559 = vsyncadd (!%p2118_p4), %s1757_s9, 4294965248  ;;  %s1766_s17 = scalar_lea.sflag [#allocation9], %s1756_s13 }
 0x3b9   : > { %2561 = dma.done.wait (!%p2118_p4), %s1766_s17, 2048  }
 0x3ba   : > { %2563 = vsyncadd (!%p2118_p4), %s1766_s17, 4294965248  ;;  %s32_s16 = sadd.s32 1, %s2594_s16   ;;  %s3540_s21 = sld [smem:[#allocation15_spill]] }
 0x3bb   : > { %p29_p6 = scmp.ge.s32.totalorder %s32_s16, 6   ;;  %s3541_s11 = sld [smem:[#allocation20_spill]] }
 0x3bc   : > { %s3542_s5 = sld [smem:[#allocation16_spill]]  ;;  %s3543_s18 = sld [smem:[#allocation17_spill]] }
 0x3bd   : > { %s3544_s30 = smov %s2570_s10  ;;  %s3546_s12 = smov %s2586_s14 }
 0x3be   : > { %s3547_s13 = smov %s2590_s15  ;;  %31 = sbr.rel (!%p29_p6) target bundleno = 17 (0x11), region = 133 }
 0x3c0   : > { %s3545_s10 = smov %s3540_s21 }
 0x3c2   : > { %s3548_s14 = smov %s3542_s5  ;;  %s3549_s15 = smov %s3543_s18 }
 0x3c5   :  { %1771 = vsyncpa [#allocation3], 1 }
 0x3c6   :  { %1773 = vsyncpa [#allocation3 + $0x1], 1 }
 0x3c7   :  { %1774 = vsyncpa [#allocation6], 1 }
 0x3c8   :  { %1776 = vsyncpa [#allocation6 + $0x1], 1 }
 0x3c9   :  { %1777 = vsyncpa [#allocation4], 1 }
 0x3ca   :  { %1779 = vsyncpa [#allocation4 + $0x1], 1 }
 0x3cb   :  { %1780 = vsyncpa [#allocation9], 1 }
 0x3cc   :  { %1782 = vsyncpa [#allocation9 + $0x1], 1 }

</bundles_post_ra>
